<compile_context>
chip_gen: v7x
topology: tpu7x:2x2x1
jax: 0.10.0
libtpu: 0.0.40
codegen_flags: <defaults>
</compile_context>

<pallas_src>
import functools

import jax
import jax.numpy as jnp
from jax.experimental import pallas as pl
from jax.experimental.pallas import tpu as pltpu


def mlp_kernel(x_ref, w0_ref, b0_ref, wh_ref, bh_ref, wo_ref, bo_ref, o_ref,
               *, excluded_vol=True):
    # x_ref : (1, T)    f32   distances for this tile, batch on lanes
    # w0_ref: (H, 1)    f32   Linear(1, H) weight (PyTorch (out, in) layout)
    # b0_ref: (H, 1)    f32
    # wh_ref: (L, H, H) bf16  hidden Linear(H, H) weights ((out, in) layout)
    # bh_ref: (L, H, 1) f32
    # wo_ref: (H, 1)    f32   Linear(H, 1) weight as a column
    # bo_ref: SMEM (1,) f32   output bias scalar
    # o_ref : (1, T)    f32
    x = x_ref[...]                                            # (1, T) f32

    # Layer 0: Linear(1, H) + ReLU.  K=1 contraction == rank-1 broadcast
    # multiply; keep it on the VPU in f32 instead of a degenerate matmul.
    h = jnp.maximum(w0_ref[...] * x + b0_ref[...], 0.0)       # (H, T) f32

    # Hidden layers: Linear(H, H) + ReLU, statically unrolled.
    # bf16 operands -> single-pass MXU; f32 accumulate; f32 elementwise.
    for l in range(wh_ref.shape[0]):
        wl = wh_ref[l]                                         # (H, H) bf16
        hm = jnp.dot(wl, h.astype(wl.dtype),
                     preferred_element_type=jnp.float32)       # (H, T) f32
        h = jnp.maximum(hm + bh_ref[l], 0.0)

    # Output layer: Linear(H, 1) as VPU multiply + sublane reduction (an
    # N=1 matmul would waste a full MXU pass); result is lane-dense (1, T).
    y = jnp.sum(h * wo_ref[...], axis=0, keepdims=True) + bo_ref[0]

    if excluded_vol:
        # (0.6 / x) ** 12 on full-width lane-dense vregs.
        r = 0.6 / x
        r3 = r * r * r
        r6 = r3 * r3
        y = y + r6 * r6

    o_ref[...] = y


def _round_up(a, b):
    return ((a + b - 1) // b) * b


def mlp_forward(x, w0, b0, wh, bh, wo, bo, *, excluded_vol=True,
                tile_batch=4096, matmul_dtype=jnp.bfloat16):
    """Fused MLP potential.

    x : (N, 1) f32.  Parameters in the natural PyTorch layouts:
      w0: (H, 1), b0: (H,), wh: (L, H, H), bh: (L, H), wo: (1, H), bo: (1,).
    Returns (N, 1) f32.
    """
    assert x.ndim == 2 and x.shape[1] == 1, "MLP expects (N, 1) input (D_in=1)"
    assert tile_batch % 128 == 0
    n = x.shape[0]
    H = w0.shape[0]
    L = wh.shape[0]

    # Lane-dense batch layout: batch on the lane axis, x laid out as (1, Np).
    # Tile is a multiple of 128 lanes; shrink it so the grid has >= 4 steps
    # (>= 2 per TensorCore on v7x) whenever the batch is big enough.
    n128 = _round_up(n, 128)
    t = min(tile_batch, n128)
    if n128 >= 4 * 128:
        t = min(t, _round_up(n128 // 4, 128))
    np_total = _round_up(n, t)
    grid = np_total // t

    xf = x.astype(jnp.float32).reshape(-1)
    if np_total != n:
        # Pad with 1.0 so (0.6/x)**12 stays finite on padded lanes; padded
        # lanes are independent element-wise work and are sliced away below.
        xf = jnp.pad(xf, (0, np_total - n), constant_values=1.0)
    x2d = xf.reshape(1, np_total)

    # Parameters in kernel layouts (single cheap host-side prep per call).
    w0c = w0.astype(jnp.float32).reshape(H, 1)
    b0c = b0.astype(jnp.float32).reshape(H, 1)
    whc = wh.astype(matmul_dtype)                      # (L, H, H) bf16 for MXU
    bhc = bh.astype(jnp.float32).reshape(L, H, 1)
    woc = wo.astype(jnp.float32).reshape(H, 1)         # column for VPU reduce
    boc = bo.astype(jnp.float32).reshape(1)

    out2d = pl.pallas_call(
        functools.partial(mlp_kernel, excluded_vol=excluded_vol),
        out_shape=jax.ShapeDtypeStruct((1, np_total), jnp.float32),
        grid_spec=pltpu.PrefetchScalarGridSpec(
            num_scalar_prefetch=0,
            grid=(grid,),
            in_specs=[
                pl.BlockSpec((1, t), lambda i: (0, i)),            # x (lane-dense)
                pl.BlockSpec((H, 1), lambda i: (0, 0)),            # W0 (resident)
                pl.BlockSpec((H, 1), lambda i: (0, 0)),            # b0
                pl.BlockSpec((L, H, H), lambda i: (0, 0, 0)),      # hidden Ws
                pl.BlockSpec((L, H, 1), lambda i: (0, 0, 0)),      # hidden bs
                pl.BlockSpec((H, 1), lambda i: (0, 0)),            # W_out column
                pl.BlockSpec(memory_space=pltpu.MemorySpace.SMEM), # b_out scalar
            ],
            out_specs=pl.BlockSpec((1, t), lambda i: (0, i)),      # lane-dense out
        ),
        compiler_params=pltpu.CompilerParams(
            dimension_semantics=("parallel",),
        ),
    )(x2d, w0c, b0c, whc, bhc, woc, boc)

    return out2d.reshape(-1)[:n].reshape(n, 1)


def mlp_reference(x, w0, b0, wh, bh, wo, bo, excluded_vol=True):
    """Pure-JAX reference mirroring the PyTorch forward (f32 HIGHEST)."""
    p = jax.lax.Precision.HIGHEST
    h = jnp.maximum(jnp.dot(x, w0.T, precision=p) + b0, 0.0)
    for l in range(wh.shape[0]):
        h = jnp.maximum(jnp.dot(h, wh[l].T, precision=p) + bh[l], 0.0)
    y = jnp.dot(h, wo.T, precision=p) + bo
    if excluded_vol:
        y = y + (0.6 / x) ** 12
    return y


if __name__ == "__main__":
    H = 128   # hidden width (module default)
    L = 3     # num_layers=3 hidden Linear(H, H) blocks
    N = 1024  # batch of pairwise distances -> grid of 4 tiles of 256 lanes

    key = jax.random.PRNGKey(0)
    ks = jax.random.split(key, 8)
    # Strictly positive "distances", shape (N, 1) since D_in=1.
    x = jax.random.uniform(ks[0], (N, 1), jnp.float32, minval=0.5, maxval=2.0)

    s = 0.1
    w0 = jax.random.uniform(ks[1], (H, 1), jnp.float32, -s, s)
    b0 = jax.random.uniform(ks[2], (H,), jnp.float32, -s, s)
    wh = jax.random.uniform(ks[3], (L, H, H), jnp.float32, -s, s)
    bh = jax.random.uniform(ks[4], (L, H), jnp.float32, -s, s)
    wo = jax.random.uniform(ks[5], (1, H), jnp.float32, -s, s)
    bo = jax.random.uniform(ks[6], (1,), jnp.float32, -s, s)

    out = mlp_forward(x, w0, b0, wh, bh, wo, bo, excluded_vol=True)
    jax.block_until_ready(out)

    ref = mlp_reference(x, w0, b0, wh, bh, wo, bo, excluded_vol=True)
    assert out.shape == (N, 1) and out.dtype == jnp.float32
    max_err = float(jnp.max(jnp.abs(out - ref)))
    # bf16 matmul operands (f32 accumulate) vs. an f32-HIGHEST reference.
    assert jnp.allclose(out, ref, rtol=2e-2, atol=2e-2), max_err

    print("KERNEL_OK")
</pallas_src>

<mosaic_0001>
module attributes {stable_mosaic.version = 11 : i64} {
  func.func @mlp_kernel(%arg0: i32, %arg1: memref<1x256xf32, #tpu.memory_space<vmem>>, %arg2: memref<128x1xf32, #tpu.memory_space<vmem>>, %arg3: memref<128x1xf32, #tpu.memory_space<vmem>>, %arg4: memref<3x128x128xbf16, #tpu.memory_space<vmem>>, %arg5: memref<3x128x1xf32, #tpu.memory_space<vmem>>, %arg6: memref<128x1xf32, #tpu.memory_space<vmem>>, %arg7: memref<1xf32, #tpu.memory_space<smem>>, %arg8: memref<1x256xf32, #tpu.memory_space<vmem>>) attributes {dimension_semantics = [#tpu.dimension_semantics<parallel>], iteration_bounds = array<i64: 4>, scalar_prefetch = 0 : i64, scratch_operands = 0 : i64, tpu.core_type = #tpu.core_type<tc>, window_params = [{transform_indices = @transform_0, window_bounds = array<i64: 1, 256>}, {pipeline_mode = #tpu.pipeline_mode<synchronous>, transform_indices = @transform_1, window_bounds = array<i64: 128, 1>}, {pipeline_mode = #tpu.pipeline_mode<synchronous>, transform_indices = @transform_2, window_bounds = array<i64: 128, 1>}, {pipeline_mode = #tpu.pipeline_mode<synchronous>, transform_indices = @transform_3, window_bounds = array<i64: 3, 128, 128>}, {pipeline_mode = #tpu.pipeline_mode<synchronous>, transform_indices = @transform_4, window_bounds = array<i64: 3, 128, 1>}, {pipeline_mode = #tpu.pipeline_mode<synchronous>, transform_indices = @transform_5, window_bounds = array<i64: 128, 1>}, {transform_indices = @transform_6, window_bounds = array<i64: 1>}, {transform_indices = @transform_7, window_bounds = array<i64: 1, 256>}]} {
    %c0 = arith.constant 0 : index
    %c0_0 = arith.constant 0 : index
    %0 = vector.load %arg1[%c0, %c0_0] : memref<1x256xf32, #tpu.memory_space<vmem>>, vector<1x256xf32>
    %c0_1 = arith.constant 0 : index
    %c0_2 = arith.constant 0 : index
    %1 = vector.load %arg2[%c0_1, %c0_2] : memref<128x1xf32, #tpu.memory_space<vmem>>, vector<128x1xf32>
    %2 = vector.broadcast %1 : vector<128x1xf32> to vector<128x256xf32>
    %3 = vector.broadcast %0 : vector<1x256xf32> to vector<128x256xf32>
    %4 = arith.mulf %2, %3 : vector<128x256xf32>
    %c0_3 = arith.constant 0 : index
    %c0_4 = arith.constant 0 : index
    %5 = vector.load %arg3[%c0_3, %c0_4] : memref<128x1xf32, #tpu.memory_space<vmem>>, vector<128x1xf32>
    %6 = vector.broadcast %5 : vector<128x1xf32> to vector<128x256xf32>
    %7 = arith.addf %4, %6 : vector<128x256xf32>
    %cst = arith.constant 0.000000e+00 : f32
    %8 = vector.broadcast %cst : f32 to vector<128x256xf32>
    %9 = arith.maximumf %7, %8 : vector<128x256xf32>
    %c0_5 = arith.constant 0 : index
    %c0_6 = arith.constant 0 : index
    %c0_7 = arith.constant 0 : index
    %10 = vector.load %arg4[%c0_5, %c0_6, %c0_7] : memref<3x128x128xbf16, #tpu.memory_space<vmem>>, vector<1x128x128xbf16>
    %11 = vector.shape_cast %10 : vector<1x128x128xbf16> to vector<128x128xbf16>
    %12 = arith.truncf %9 : vector<128x256xf32> to vector<128x256xbf16>
    %cst_8 = arith.constant dense<0.000000e+00> : vector<128x256xf32>
    %13 = tpu.matmul %11, %12, %cst_8 {dimension_numbers = #tpu.dot_dimension_numbers<[1], [0], [0], [1], [0, 0, 1, 1], [], []>} : vector<128x128xbf16>, vector<128x256xbf16>, vector<128x256xf32> -> vector<128x256xf32>
    %c0_9 = arith.constant 0 : index
    %c0_10 = arith.constant 0 : index
    %c0_11 = arith.constant 0 : index
    %14 = vector.load %arg5[%c0_9, %c0_10, %c0_11] : memref<3x128x1xf32, #tpu.memory_space<vmem>>, vector<1x128x1xf32>
    %15 = vector.shape_cast %14 : vector<1x128x1xf32> to vector<128x1xf32>
    %16 = vector.broadcast %15 : vector<128x1xf32> to vector<128x256xf32>
    %17 = arith.addf %13, %16 : vector<128x256xf32>
    %cst_12 = arith.constant 0.000000e+00 : f32
    %18 = vector.broadcast %cst_12 : f32 to vector<128x256xf32>
    %19 = arith.maximumf %17, %18 : vector<128x256xf32>
    %c1 = arith.constant 1 : index
    %c0_13 = arith.constant 0 : index
    %c0_14 = arith.constant 0 : index
    %20 = vector.load %arg4[%c1, %c0_13, %c0_14] : memref<3x128x128xbf16, #tpu.memory_space<vmem>>, vector<1x128x128xbf16>
    %21 = vector.shape_cast %20 : vector<1x128x128xbf16> to vector<128x128xbf16>
    %22 = arith.truncf %19 : vector<128x256xf32> to vector<128x256xbf16>
    %cst_15 = arith.constant dense<0.000000e+00> : vector<128x256xf32>
    %23 = tpu.matmul %21, %22, %cst_15 {dimension_numbers = #tpu.dot_dimension_numbers<[1], [0], [0], [1], [0, 0, 1, 1], [], []>} : vector<128x128xbf16>, vector<128x256xbf16>, vector<128x256xf32> -> vector<128x256xf32>
    %c1_16 = arith.constant 1 : index
    %c0_17 = arith.constant 0 : index
    %c0_18 = arith.constant 0 : index
    %24 = vector.load %arg5[%c1_16, %c0_17, %c0_18] : memref<3x128x1xf32, #tpu.memory_space<vmem>>, vector<1x128x1xf32>
    %25 = vector.shape_cast %24 : vector<1x128x1xf32> to vector<128x1xf32>
    %26 = vector.broadcast %25 : vector<128x1xf32> to vector<128x256xf32>
    %27 = arith.addf %23, %26 : vector<128x256xf32>
    %cst_19 = arith.constant 0.000000e+00 : f32
    %28 = vector.broadcast %cst_19 : f32 to vector<128x256xf32>
    %29 = arith.maximumf %27, %28 : vector<128x256xf32>
    %c2 = arith.constant 2 : index
    %c0_20 = arith.constant 0 : index
    %c0_21 = arith.constant 0 : index
    %30 = vector.load %arg4[%c2, %c0_20, %c0_21] : memref<3x128x128xbf16, #tpu.memory_space<vmem>>, vector<1x128x128xbf16>
    %31 = vector.shape_cast %30 : vector<1x128x128xbf16> to vector<128x128xbf16>
    %32 = arith.truncf %29 : vector<128x256xf32> to vector<128x256xbf16>
    %cst_22 = arith.constant dense<0.000000e+00> : vector<128x256xf32>
    %33 = tpu.matmul %31, %32, %cst_22 {dimension_numbers = #tpu.dot_dimension_numbers<[1], [0], [0], [1], [0, 0, 1, 1], [], []>} : vector<128x128xbf16>, vector<128x256xbf16>, vector<128x256xf32> -> vector<128x256xf32>
    %c2_23 = arith.constant 2 : index
    %c0_24 = arith.constant 0 : index
    %c0_25 = arith.constant 0 : index
    %34 = vector.load %arg5[%c2_23, %c0_24, %c0_25] : memref<3x128x1xf32, #tpu.memory_space<vmem>>, vector<1x128x1xf32>
    %35 = vector.shape_cast %34 : vector<1x128x1xf32> to vector<128x1xf32>
    %36 = vector.broadcast %35 : vector<128x1xf32> to vector<128x256xf32>
    %37 = arith.addf %33, %36 : vector<128x256xf32>
    %cst_26 = arith.constant 0.000000e+00 : f32
    %38 = vector.broadcast %cst_26 : f32 to vector<128x256xf32>
    %39 = arith.maximumf %37, %38 : vector<128x256xf32>
    %c0_27 = arith.constant 0 : index
    %c0_28 = arith.constant 0 : index
    %40 = vector.load %arg6[%c0_27, %c0_28] : memref<128x1xf32, #tpu.memory_space<vmem>>, vector<128x1xf32>
    %41 = vector.broadcast %40 : vector<128x1xf32> to vector<128x256xf32>
    %42 = arith.mulf %39, %41 : vector<128x256xf32>
    %cst_29 = arith.constant dense<0.000000e+00> : vector<256xf32>
    %43 = vector.multi_reduction <add>, %42, %cst_29 [0] : vector<128x256xf32> to vector<256xf32>
    %44 = vector.shape_cast %43 : vector<256xf32> to vector<1x256xf32>
    %c0_30 = arith.constant 0 : index
    %45 = memref.load %arg7[%c0_30] : memref<1xf32, #tpu.memory_space<smem>>
    %46 = vector.broadcast %45 : f32 to vector<1x256xf32>
    %47 = arith.addf %44, %46 : vector<1x256xf32>
    %cst_31 = arith.constant 6.000000e-01 : f32
    %48 = vector.broadcast %cst_31 : f32 to vector<1x256xf32>
    %49 = arith.divf %48, %0 : vector<1x256xf32>
    %50 = arith.mulf %49, %49 : vector<1x256xf32>
    %51 = arith.mulf %50, %49 : vector<1x256xf32>
    %52 = arith.mulf %51, %51 : vector<1x256xf32>
    %53 = arith.mulf %52, %52 : vector<1x256xf32>
    %54 = arith.addf %47, %53 : vector<1x256xf32>
    %c0_32 = arith.constant 0 : index
    %c0_33 = arith.constant 0 : index
    %55 = vector.load %arg8[%c0_32, %c0_33] : memref<1x256xf32, #tpu.memory_space<vmem>>, vector<1x256xf32>
    tpu.vector_store %arg8[%c0_32, %c0_33], %54 {strides = array<i32>} : memref<1x256xf32, #tpu.memory_space<vmem>>, vector<1x256xf32>,
    return
  }
  func.func @transform_0(%arg0: i32) -> (i32, i32) {
    %c0_i32 = arith.constant 0 : i32
    %c0_i32_0 = arith.constant 0 : i32
    return %c0_i32, %arg0 : i32, i32
  }
  func.func @transform_1(%arg0: i32) -> (i32, i32) {
    %c0_i32 = arith.constant 0 : i32
    %c0_i32_0 = arith.constant 0 : i32
    %c0_i32_1 = arith.constant 0 : i32
    return %c0_i32, %c0_i32_0 : i32, i32
  }
  func.func @transform_2(%arg0: i32) -> (i32, i32) {
    %c0_i32 = arith.constant 0 : i32
    %c0_i32_0 = arith.constant 0 : i32
    %c0_i32_1 = arith.constant 0 : i32
    return %c0_i32, %c0_i32_0 : i32, i32
  }
  func.func @transform_3(%arg0: i32) -> (i32, i32, i32) {
    %c0_i32 = arith.constant 0 : i32
    %c0_i32_0 = arith.constant 0 : i32
    %c0_i32_1 = arith.constant 0 : i32
    %c0_i32_2 = arith.constant 0 : i32
    return %c0_i32, %c0_i32_0, %c0_i32_1 : i32, i32, i32
  }
  func.func @transform_4(%arg0: i32) -> (i32, i32, i32) {
    %c0_i32 = arith.constant 0 : i32
    %c0_i32_0 = arith.constant 0 : i32
    %c0_i32_1 = arith.constant 0 : i32
    %c0_i32_2 = arith.constant 0 : i32
    return %c0_i32, %c0_i32_0, %c0_i32_1 : i32, i32, i32
  }
  func.func @transform_5(%arg0: i32) -> (i32, i32) {
    %c0_i32 = arith.constant 0 : i32
    %c0_i32_0 = arith.constant 0 : i32
    %c0_i32_1 = arith.constant 0 : i32
    return %c0_i32, %c0_i32_0 : i32, i32
  }
  func.func @transform_6(%arg0: i32) -> i32 {
    %c0_i32 = arith.constant 0 : i32
    %c0_i32_0 = arith.constant 0 : i32
    return %c0_i32 : i32
  }
  func.func @transform_7(%arg0: i32) -> (i32, i32) {
    %c0_i32 = arith.constant 0 : i32
    %c0_i32_0 = arith.constant 0 : i32
    return %c0_i32, %arg0 : i32, i32
  }
}

</mosaic_0001>

<bundles_post_ra>
// kernel: tpu_custom_call.1
= control target key start
LH: loop header
LB: loop body
LE: loop exit
PB: predicated region body
PF: predicated region fallthrough
CT: control target
= control target key end

     0   :  { %s2705_s0 = inlined_call_operand.vmem [shape: f32[1,1024], index: 0, kind: input, shape index: {}]   ;;  %s2706_s1 = inlined_call_operand.vmem [shape: f32[128,1], index: 1, kind: input, shape index: {}]   ;;  %s2707_s2 = inlined_call_operand.vmem [shape: f32[128,1], index: 2, kind: input, shape index: {}]   ;;  %s2708_s3 = inlined_call_operand.vmem [shape: bf16[3,128,128], index: 3, kind: input, shape index: {}]   ;;  %s2709_s4 = inlined_call_operand.vmem [shape: f32[3,128,1], index: 4, kind: input, shape index: {}]   ;;  %s2710_s5 = inlined_call_operand.vmem [shape: f32[128,1], index: 5, kind: input, shape index: {}]   ;;  %s2711_s6 = inlined_call_operand.<no memory space> [shape: f32[1], index: 6, kind: input, shape index: {}]   ;;  %s2712_s7 = inlined_call_operand.hbm [shape: f32[1,1024], index: 7, kind: output, shape index: {}]  }
   0x1   :  { %12 = sst [smem:[#allocation2]] %s2711_s6 }
   0x2   :  { %13 = vsyncpa [#allocation4], 0 }
   0x3   :  { %15 = vsyncpa [#allocation4 + $0x1], 0  ;;  %s2129_s26 = smov 0   ;;  %s2131_s27 = smov 0  }
   0x4   :  { %s2133_s28 = smov 0   ;;  %s2135_s29 = smov 0  }
   0x5 LB: > { %s2150_s6 = sadd.s32 4294967295, %s2081_s29   ;;  %s1833_s30 = sadd.s32 4294967294, %s2081_s29   ;;  %s2081_s29 = sphi %s2135_s29, %s2718_s29   ;;  %s2077_s28 = sphi %s2133_s28, %s2717_s28   ;;  %s2073_s27 = sphi %s2131_s27, %s2716_s27   ;;  %s2069_s26 = sphi %s2129_s26, %s2715_s26  }
   0x6   : > { %s2154_s8 = sadd.s32 1, %s2081_s29   ;;  %s180_s9 = sadd.s32 1, %s2077_s28 }
   0x7   : > { %s177_s10 = ssub.s32 %s2081_s29, %s2154_s8  ;;  %p190_p0 = scmp.ne.s32.totalorder %s2077_s28, %s2073_s27 }
   0x8   : > { %p178_p1 = scmp.eq.s32.totalorder %s177_s10, 0  ;;  %p191_p2 = scmp.eq.s32.totalorder %s2150_s6, 3 }
   0x9   : > { %p196_p3 = scmp.ne.s32.totalorder %s2073_s27, %s2069_s26  ;;  %p197_p4 = scmp.eq.s32.totalorder %s1833_s30, 3 }
   0xa   : > { %s2165_s11 = scalar_select %p178_p1, %s2077_s28, %s180_s9  }
   0xb   : > { %p2167_p5 = por %p191_p2, %p190_p0  ;;  %p2171_p6 = por %p197_p4, %p196_p3 }
   0xc   : > { %p1836_p7 = scmp.ge.s32.totalorder %s2081_s29, 1  ;;  %p241_p8 = scmp.lt.s32.totalorder %s2081_s29, 5 }
   0xe   : > { %p242_p9 = pnand %p1836_p7, %p241_p8 }
   0xf   : > { %v419_v0 = vld [vmem:[%s2707_s2] sm:$0xff] (!%p242_p9)  ;;  %v2083_v2 = vmov (!%p242_p9), 0   ;;  %v420_v3 = vld [vmem:[%s2707_s2 + $0x8] sm:$0xff] (!%p242_p9)  ;;  %v283_v5 = vld [vmem:[%s2706_s1 + $0x18] sm:$0xff] (!%p242_p9)  ;;  %s1838_s21 = sshll.u32 (!%p242_p9), %s2150_s6, 1  ;;  %v377_v61 = vlaneseq (!%p242_p9)  ;;  %s1932_s10 = sshll.u32 (!%p242_p9), %s2150_s6, 5 }
  0x10   : > { %245 = sbr.rel (%p242_p9) target bundleno = 1076 (0x434), region = 48  ;;  %v280_v1 = vld [vmem:[%s2706_s1] sm:$0xff] (!%p242_p9)  ;;  %1991 = vset.pattern.permute.xlu1 (!%p242_p9), %v2083_v2  ;;  %1990 = vset.pattern.permute.xlu0 (!%p242_p9), %v2083_v2  ;;  %v281_v4 = vld [vmem:[%s2706_s1 + $0x8] sm:$0xff] (!%p242_p9)  ;;  %v282_v6 = vld [vmem:[%s2706_s1 + $0x10] sm:$0xff] (!%p242_p9)  ;;  %p273_p10 = scmp.lt.s32.totalorder (!%p242_p9), %s1838_s21, 7 }
  0x11   : > { %437 = vperm.xlu1 (!%p242_p9), %1991, %v419_v0   ;;  %298 = vperm.xlu0 (!%p242_p9), %1990, %v280_v1   ;;  %v422_v7 = vld [vmem:[%s2707_s2 + $0x18] sm:$0xff] (!%p242_p9)  ;;  %v421_v8 = vld [vmem:[%s2707_s2 + $0x10] sm:$0xff] (!%p242_p9)  ;;  %v285_v9 = vld [vmem:[%s2706_s1 + $0x28] sm:$0xff] (!%p242_p9)  ;;  %v2369_v0 = vshrl.u32 (!%p242_p9), %v377_v61, 7  ;;  %vm1759_vm0 = vcmp.lt.s32.totalorder (!%p242_p9), %v377_v61, 256  ;;  %s2663_s18 = scalar_lea.hbm (!%p242_p9), %s2712_s7, %s1932_s10  ;;  %s2085_s6 = smov (!%p242_p9), [#allocation3]  }
  0x12   : > { %787 = vmatprep.mubr.bf16.mxu0 (!%p242_p9), %v2083_v2  ;;  %827 = vmatprep.mubr.bf16.mxu1 (!%p242_p9), %v2083_v2  ;;  %v284_v10 = vld [vmem:[%s2706_s1 + $0x20] sm:$0xff] (!%p242_p9)  ;;  %v424_v11 = vld [vmem:[%s2707_s2 + $0x28] sm:$0xff] (!%p242_p9)  ;;  %v287_v13 = vld [vmem:[%s2706_s1 + $0x38] sm:$0xff] (!%p242_p9)  ;;  %s2023_s23 = sshll.u32 (!%p242_p9), %s2085_s6, 4  ;;  %s2024_s23 = int_to_ptr.vmem [resolvable:$false] %s2023_s23 }
  0x13   : > { %v423_v12 = vld [vmem:[%s2707_s2 + $0x20] sm:$0xff] (!%p242_p9)  ;;  %v286_v14 = vld [vmem:[%s2706_s1 + $0x30] sm:$0xff] (!%p242_p9)  ;;  %v426_v15 = vld [vmem:[%s2707_s2 + $0x38] sm:$0xff] (!%p242_p9)  ;;  %s2025_s24 = scalar_lea.vmem (!%p242_p9), %s2024_s23, 64 }
  0x14   : > { %v425_v16 = vld [vmem:[%s2707_s2 + $0x30] sm:$0xff] (!%p242_p9)  ;;  %v289_v17 = vld [vmem:[%s2706_s1 + $0x48] sm:$0xff] (!%p242_p9)  ;;  %v288_v18 = vld [vmem:[%s2706_s1 + $0x40] sm:$0xff] (!%p242_p9) }
  0x15   : > { %442 = vperm.xlu1 (!%p242_p9), %1991, %v420_v3   ;;  %303 = vperm.xlu0 (!%p242_p9), %1990, %v281_v4   ;;  %v428_v19 = vld [vmem:[%s2707_s2 + $0x48] sm:$0xff] (!%p242_p9)  ;;  %v427_v20 = vld [vmem:[%s2707_s2 + $0x40] sm:$0xff] (!%p242_p9)  ;;  %v291_v21 = vld [vmem:[%s2706_s1 + $0x58] sm:$0xff] (!%p242_p9)  ;;  %v379_v4 = vsub.s32 (!%p242_p9), 0, %v2369_v0 }
  0x16   : > { %v290_v22 = vld [vmem:[%s2706_s1 + $0x50] sm:$0xff] (!%p242_p9)  ;;  %v430_v23 = vld [vmem:[%s2707_s2 + $0x58] sm:$0xff] (!%p242_p9)  ;;  %v293_v25 = vld [vmem:[%s2706_s1 + $0x68] sm:$0xff] (!%p242_p9) }
  0x17   : > { %v429_v24 = vld [vmem:[%s2707_s2 + $0x50] sm:$0xff]  ;;  %v292_v26 = vld [vmem:[%s2706_s1 + $0x60] sm:$0xff]  ;;  %v432_v27 = vld [vmem:[%s2707_s2 + $0x68] sm:$0xff]  ;;  %s2720_s21 = smov (!%p273_p10, %s1838_s21), 7 }
  0x18   : > { %v431_v28 = vld [vmem:[%s2707_s2 + $0x60] sm:$0xff]  ;;  %v295_v29 = vld [vmem:[%s2706_s1 + $0x78] sm:$0xff]  ;;  %v294_v30 = vld [vmem:[%s2706_s1 + $0x70] sm:$0xff]  ;;  %s2374_s22 = scalar_lea.vmem %s2705_s0, %s2720_s21  ;;  %s269_s21 = sand.u32 1, %s2073_s27  }
  0x19   : > { %313 = vperm.xlu1 %1991, %v283_v5   ;;  %308 = vperm.xlu0 %1990, %v282_v6   ;;  %v434_v31 = vld [vmem:[%s2707_s2 + $0x78] sm:$0xff]  ;;  %v433_v32 = vld [vmem:[%s2707_s2 + $0x70] sm:$0xff]  ;;  %v612_v33 = vld [vmem:[%s2709_s4 + $0x8] sm:$0xff]  ;;  %v383_v5 = vsub.s32 1, %v2369_v0  ;;  %s1837_s9 = sshll.u32 %s269_s21, 1  ;;  %s1763_s19 = scalar_lea.sflag [#allocation4], %s269_s21 }
  0x1a   : > { %v611_v34 = vld [vmem:[%s2709_s4] sm:$0xff]  ;;  %v614_v35 = vld [vmem:[%s2709_s4 + $0x18] sm:$0xff]  ;;  %v613_v36 = vld [vmem:[%s2709_s4 + $0x10] sm:$0xff]  ;;  %s271_s14 = scalar_lea.vmem [#allocation3], %s1837_s9 }
  0x1b   : > { %v616_v37 = vld [vmem:[%s2709_s4 + $0x28] sm:$0xff]  ;;  %v615_v38 = vld [vmem:[%s2709_s4 + $0x20] sm:$0xff]  ;;  %v618_v39 = vld [vmem:[%s2709_s4 + $0x38] sm:$0xff]  ;;  %s1777_s15 = sshll.u32 %s271_s14, 4  ;;  %s2665_s15 = int_to_ptr.vmem [resolvable:$true] %s1777_s15 }
  0x1c   : > { %v617_v40 = vld [vmem:[%s2709_s4 + $0x30] sm:$0xff]  ;;  %v620_v41 = vld [vmem:[%s2709_s4 + $0x48] sm:$0xff]  ;;  %v619_v42 = vld [vmem:[%s2709_s4 + $0x40] sm:$0xff]  ;;  %s2019_s20 = scalar_lea.vmem %s2665_s15, 32  ;;  %p2026_p0 = scmp.lt.s32.totalorder %s2665_s15, %s2024_s23 }
  0x1d   : > { %452 = vperm.xlu1 %1991, %v422_v7   ;;  %447 = vperm.xlu0 %1990, %v421_v8   ;;  %v622_v43 = vld [vmem:[%s2709_s4 + $0x58] sm:$0xff]  ;;  %v621_v44 = vld [vmem:[%s2709_s4 + $0x50] sm:$0xff]  ;;  %v624_v45 = vld [vmem:[%s2709_s4 + $0x68] sm:$0xff]  ;;  %p2020_p11 = scmp.ne.s32.totalorder %s2665_s15, %s2019_s20  ;;  %p2027_p1 = scmp.lt.s32.totalorder %s2025_s24, %s2019_s20 }
  0x1e   : > { %v623_v46 = vld [vmem:[%s2709_s4 + $0x60] sm:$0xff]  ;;  %v626_v47 = vld [vmem:[%s2709_s4 + $0x78] sm:$0xff]  ;;  %v625_v48 = vld [vmem:[%s2709_s4 + $0x70] sm:$0xff] }
  0x1f   : > { %v1864_v49 = vld [vmem:[%s2709_s4 + $0x88] sm:$0xff]  ;;  %v1863_v50 = vld [vmem:[%s2709_s4 + $0x80] sm:$0xff]  ;;  %v1866_v51 = vld [vmem:[%s2709_s4 + $0x98] sm:$0xff]  ;;  %p2021_p12 = pnand %p2020_p11, %p2167_p5  ;;  %p2028_p2 = por %p2027_p1, %p2026_p0 }
  0x20   : > { %v1865_v52 = vld [vmem:[%s2709_s4 + $0x90] sm:$0xff]  ;;  %v1868_v53 = vld [vmem:[%s2709_s4 + $0xa8] sm:$0xff]  ;;  %v1867_v54 = vld [vmem:[%s2709_s4 + $0xa0] sm:$0xff] }
  0x21   : > { %323 = vperm.xlu1 %1991, %v285_v9   ;;  %318 = vperm.xlu0 %1990, %v284_v10   ;;  %v1870_v55 = vld [vmem:[%s2709_s4 + $0xb8] sm:$0xff]  ;;  %v1869_v56 = vld [vmem:[%s2709_s4 + $0xb0] sm:$0xff]  ;;  %v1872_v57 = vld [vmem:[%s2709_s4 + $0xc8] sm:$0xff]  ;;  %p2022_p13 = pneg %p2021_p12 }
  0x22   : > { %v1871_v58 = vld [vmem:[%s2709_s4 + $0xc0] sm:$0xff]  ;;  %v1874_v59 = vld [vmem:[%s2709_s4 + $0xd8] sm:$0xff]  ;;  %v1873_v60 = vld [vmem:[%s2709_s4 + $0xd0] sm:$0xff] }
  0x23   : > { %v1876_v62 = vld [vmem:[%s2709_s4 + $0xe8] sm:$0xff]  ;;  %v1875_v63 = vld [vmem:[%s2709_s4 + $0xe0] sm:$0xff]  ;;  %v1878_v1 = vld [vmem:[%s2709_s4 + $0xf8] sm:$0xff]  ;;  %p2029_p3 = pnand %p2028_p2, %p2022_p13 }
  0x24   : > { %v1877_v3 = vld [vmem:[%s2709_s4 + $0xf0] sm:$0xff]  ;;  %v279_v6 = vld [vmem:[%s2374_s22] sm:$0x3]  ;;  %v1904_v9 = vld [vmem:[%s2709_s4 + $0x108] sm:$0xff] }
  0x25   : > { %462 = vperm.xlu1 %1991, %v424_v11   ;;  %457 = vperm.xlu0 %1990, %v423_v12   ;;  %v2387_v7 = vrot.slane %v279_v6, %v379_v4  ;;  %v2391_v8 = vrot.slane %v279_v6, %v383_v5  ;;  %v1903_v10 = vld [vmem:[%s2709_s4 + $0x100] sm:$0xff] }
  0x29   : > { %333 = vperm.xlu1 %1991, %v287_v13   ;;  %328 = vperm.xlu0 %1990, %v286_v14  }
  0x2d   : > { %472 = vperm.xlu1 %1991, %v426_v15   ;;  %467 = vperm.xlu0 %1990, %v425_v16   ;;  %v1906_v15 = vld [vmem:[%s2709_s4 + $0x118] sm:$0xff]  ;;  %v1905_v16 = vld [vmem:[%s2709_s4 + $0x110] sm:$0xff] }
  0x31   : > { %343 = vperm.xlu1 %1991, %v289_v17   ;;  %338 = vperm.xlu0 %1990, %v288_v18  }
  0x35   : > { %482 = vperm.xlu1 %1991, %v428_v19   ;;  %477 = vperm.xlu0 %1990, %v427_v20  }
  0x39   : > { %353 = vperm.xlu1 %1991, %v291_v21   ;;  %348 = vperm.xlu0 %1990, %v290_v22  }
  0x3d   : > { %492 = vperm.xlu1 %1991, %v430_v23   ;;  %487 = vperm.xlu0 %1990, %v429_v24   ;;  %v1547_v23 = vld [vmem:[%s2710_s5 + $0x8] sm:$0xff] }
  0x41   : > { %363 = vperm.xlu1 %1991, %v293_v25   ;;  %358 = vperm.xlu0 %1990, %v292_v26   ;;  %v1546_v26 = vld [vmem:[%s2710_s5] sm:$0xff] }
  0x45   : > { %502 = vperm.xlu1 %1991, %v432_v27   ;;  %497 = vperm.xlu0 %1990, %v431_v28  }
  0x49   : > { %373 = vperm.xlu1 %1991, %v295_v29   ;;  %368 = vperm.xlu0 %1990, %v294_v30   ;;  %v1548_v29 = vld [vmem:[%s2710_s5 + $0x10] sm:$0xff] }
  0x4d   : > { %512 = vperm.xlu1 %1991, %v434_v31   ;;  %507 = vperm.xlu0 %1990, %v433_v32  }
  0x51   : > { %634 = vperm.xlu1 %1991, %v612_v33   ;;  %629 = vperm.xlu0 %1990, %v611_v34  }
  0x55   : > { %644 = vperm.xlu1 %1991, %v614_v35   ;;  %639 = vperm.xlu0 %1990, %v613_v36  }
  0x59   : > { %654 = vperm.xlu1 %1991, %v616_v37   ;;  %649 = vperm.xlu0 %1990, %v615_v38   ;;  %v1907_v38 = vld [vmem:[%s2709_s4 + $0x120] sm:$0xff] }
  0x5d   : > { %664 = vperm.xlu1 %1991, %v618_v39   ;;  %659 = vperm.xlu0 %1990, %v617_v40  }
  0x61   : > { %674 = vperm.xlu1 %1991, %v620_v41   ;;  %669 = vperm.xlu0 %1990, %v619_v42  }
  0x65   : > { %684 = vperm.xlu1 %1991, %v622_v43   ;;  %679 = vperm.xlu0 %1990, %v621_v44  }
  0x69   : > { %694 = vperm.xlu1 %1991, %v624_v45   ;;  %689 = vperm.xlu0 %1990, %v623_v46  }
  0x6d   : > { %704 = vperm.xlu1 %1991, %v626_v47   ;;  %699 = vperm.xlu0 %1990, %v625_v48   ;;  %v1549_v47 = vld [vmem:[%s2710_s5 + $0x18] sm:$0xff] }
  0x71   : > { %957 = vperm.xlu1 %1991, %v1864_v49   ;;  %952 = vperm.xlu0 %1990, %v1863_v50  }
  0x75   : > { %967 = vperm.xlu1 %1991, %v1866_v51   ;;  %962 = vperm.xlu0 %1990, %v1865_v52   ;;  %v1908_v52 = vld [vmem:[%s2709_s4 + $0x128] sm:$0xff] }
  0x79   : > { %977 = vperm.xlu1 %1991, %v1868_v53   ;;  %972 = vperm.xlu0 %1990, %v1867_v54  }
  0x7d   : > { %987 = vperm.xlu1 %1991, %v1870_v55   ;;  %982 = vperm.xlu0 %1990, %v1869_v56  }
  0x81   : > { %997 = vperm.xlu1 %1991, %v1872_v57   ;;  %992 = vperm.xlu0 %1990, %v1871_v58  }
  0x85   : > { %1007 = vperm.xlu1 %1991, %v1874_v59   ;;  %1002 = vperm.xlu0 %1990, %v1873_v60  }
  0x89   : > { %1017 = vperm.xlu1 %1991, %v1876_v62   ;;  %1012 = vperm.xlu0 %1990, %v1875_v63   ;;  %v1550_v62 = vld [vmem:[%s2710_s5 + $0x20] sm:$0xff] }
  0x8d   : > { %1027 = vperm.xlu1 %1991, %v1878_v1   ;;  %1022 = vperm.xlu0 %1990, %v1877_v3   ;;  %v1909_v3 = vld [vmem:[%s2709_s4 + $0x130] sm:$0xff] }
  0x90   : > { %v438_v11 = vpop.permute.xlu1 %437  ;;  %v299_v12 = vpop.permute.xlu0 %298 }
  0x91   : > { %1280 = vperm.xlu1 %1991, %v1904_v9   ;;  %1275 = vperm.xlu0 %1990, %v1903_v10   ;;  %v387_v13 = vmul.f32 %v2387_v7, %v299_v12  ;;  %v388_v14 = vmul.f32 %v2391_v8, %v299_v12 }
  0x93   : > { %v515_v21 = vadd.f32 %v438_v11, %v387_v13  ;;  %v516_v22 = vadd.f32 %v438_v11, %v388_v14 }
  0x94   : > { %v443_v17 = vpop.permute.xlu1 %442  ;;  %v304_v18 = vpop.permute.xlu0 %303 }
  0x95   : > { %v389_v19 = vmul.f32 %v2387_v7, %v304_v18  ;;  %v390_v20 = vmul.f32 %v2391_v8, %v304_v18  ;;  %1290 = vperm.xlu1 %1991, %v1906_v15   ;;  %1285 = vperm.xlu0 %1990, %v1905_v16   ;;  %v548_v30 = vmax.f32 %v516_v22, 0.0  ;;  %v547_v32 = vmax.f32 %v515_v21, 0.0  ;;  %v1551_v16 = vld [vmem:[%s2710_s5 + $0x28] sm:$0xff] }
  0x97   : > { %v517_v24 = vadd.f32 %v443_v17, %v389_v19  ;;  %v518_v25 = vadd.f32 %v443_v17, %v390_v20  ;;  %v1910_v19 = vld [vmem:[%s2709_s4 + $0x138] sm:$0xff] }
  0x98   : > { %v314_v27 = vpop.permute.xlu1 %313  ;;  %v309_v28 = vpop.permute.xlu0 %308 }
  0x99   : > { %1569 = vperm.xlu1 %1991, %v1547_v23   ;;  %1564 = vperm.xlu0 %1990, %v1546_v26   ;;  %v550_v31 = vmax.f32 %v518_v25, 0.0  ;;  %v549_v33 = vmax.f32 %v517_v24, 0.0  ;;  %v393_v34 = vmul.f32 %v2387_v7, %v314_v27  ;;  %v394_v35 = vmul.f32 %v2391_v8, %v314_v27  ;;  %v1552_v26 = vld [vmem:[%s2710_s5 + $0x30] sm:$0xff] }
  0x9a   : > { %v391_v36 = vmul.f32 %v2387_v7, %v309_v28  ;;  %v392_v37 = vmul.f32 %v2391_v8, %v309_v28 }
  0x9b   : > { %v596_v41 = vpack.c.bf16 %v550_v31, %v548_v30  ;;  %v595_v42 = vpack.c.bf16 %v549_v33, %v547_v32 }
  0x9c   : > { %v453_v39 = vpop.permute.xlu1 %452  ;;  %v448_v40 = vpop.permute.xlu0 %447 }
  0x9d   : > { %v521_v43 = vadd.f32 %v453_v39, %v393_v34  ;;  %v522_v44 = vadd.f32 %v453_v39, %v394_v35  ;;  %v519_v45 = vadd.f32 %v448_v40, %v391_v36  ;;  %v520_v46 = vadd.f32 %v448_v40, %v392_v37  ;;  %1574 = vperm.xlu1 %1991, %v1548_v29   ;;  %v1911_v29 = vld [vmem:[%s2709_s4 + $0x140] sm:$0xff] }
  0x9e   : > { %1295 = vperm.xlu0 %1990, %v1907_v38   ;;  %755 = vmatprep.subr.bf16.mxu0 %v596_v41  ;;  %v1553_v38 = vld [vmem:[%s2710_s5 + $0x38] sm:$0xff] }
  0x9f   : > { %v553_v48 = vmax.f32 %v521_v43, 0.0  ;;  %v554_v49 = vmax.f32 %v522_v44, 0.0  ;;  %v551_v50 = vmax.f32 %v519_v45, 0.0  ;;  %v552_v51 = vmax.f32 %v520_v46, 0.0  ;;  %1933 = vmatprep.subr.bf16.mxu1 %v596_v41  ;;  %756 = vmatpush1.bf16.msra.mxu0 %v595_v42  ;;  %v1912_v41 = vld [vmem:[%s2709_s4 + $0x148] sm:$0xff] }
  0xa0   : > { %1941 = vmatpush1.bf16.msra.mxu1 %v595_v42  ;;  %v324_v53 = vpop.permute.xlu1 %323  ;;  %v319_v54 = vpop.permute.xlu0 %318 }
  0xa1   : > { %1579 = vperm.xlu1 %1991, %v1549_v47   ;;  %v598_v55 = vpack.c.bf16 %v554_v49, %v552_v51  ;;  %v597_v56 = vpack.c.bf16 %v553_v48, %v551_v50  ;;  %v397_v57 = vmul.f32 %v2387_v7, %v324_v53  ;;  %v398_v58 = vmul.f32 %v2391_v8, %v324_v53  ;;  %v1554_v48 = vld [vmem:[%s2710_s5 + $0x40] sm:$0xff]  ;;  %v1913_v51 = vld [vmem:[%s2709_s4 + $0x150] sm:$0xff] }
  0xa2   : > { %1300 = vperm.xlu0 %1990, %v1908_v52   ;;  %v395_v59 = vmul.f32 %v2387_v7, %v319_v54  ;;  %v396_v60 = vmul.f32 %v2391_v8, %v319_v54 }
  0xa3   : > { %757 = vmatprep.subr.bf16.mxu0 %v598_v55  ;;  %1934 = vmatprep.subr.bf16.mxu1 %v598_v55 }
  0xa4   : > { %v463_v63 = vpop.permute.xlu1 %462  ;;  %v458_v1 = vpop.permute.xlu0 %457  ;;  %758 = vmatpush1.bf16.msra.mxu0 %v597_v56  ;;  %1942 = vmatpush1.bf16.msra.mxu1 %v597_v56 }
  0xa5   : > { %v525_v6 = vadd.f32 %v463_v63, %v397_v57  ;;  %v526_v9 = vadd.f32 %v463_v63, %v398_v58  ;;  %v523_v10 = vadd.f32 %v458_v1, %v395_v59  ;;  %v524_v11 = vadd.f32 %v458_v1, %v396_v60  ;;  %1584 = vperm.xlu1 %1991, %v1550_v62   ;;  %v1555_v60 = vld [vmem:[%s2710_s5 + $0x48] sm:$0xff]  ;;  %v1914_v1 = vld [vmem:[%s2709_s4 + $0x158] sm:$0xff] }
  0xa6   : > { %1305 = vperm.xlu0 %1990, %v1909_v3  }
  0xa7   : > { %v557_v12 = vmax.f32 %v525_v6, 0.0  ;;  %v558_v13 = vmax.f32 %v526_v9, 0.0  ;;  %v555_v14 = vmax.f32 %v523_v10, 0.0  ;;  %v556_v15 = vmax.f32 %v524_v11, 0.0 }
  0xa8   : > { %v334_v17 = vpop.permute.xlu1 %333  ;;  %v329_v18 = vpop.permute.xlu0 %328 }
  0xa9   : > { %1589 = vperm.xlu1 %1991, %v1551_v16   ;;  %v600_v20 = vpack.c.bf16 %v558_v13, %v556_v15  ;;  %v599_v21 = vpack.c.bf16 %v557_v12, %v555_v14  ;;  %v401_v22 = vmul.f32 %v2387_v7, %v334_v17  ;;  %v402_v23 = vmul.f32 %v2391_v8, %v334_v17  ;;  %v1556_v13 = vld [vmem:[%s2710_s5 + $0x50] sm:$0xff]  ;;  %v1915_v16 = vld [vmem:[%s2709_s4 + $0x160] sm:$0xff] }
  0xaa   : > { %v399_v24 = vmul.f32 %v2387_v7, %v329_v18  ;;  %v400_v25 = vmul.f32 %v2391_v8, %v329_v18  ;;  %1310 = vperm.xlu0 %1990, %v1910_v19  }
  0xab   : > { %759 = vmatprep.subr.bf16.mxu0 %v600_v20  ;;  %1935 = vmatprep.subr.bf16.mxu1 %v600_v20 }
  0xac   : > { %v473_v27 = vpop.permute.xlu1 %472  ;;  %v468_v28 = vpop.permute.xlu0 %467  ;;  %760 = vmatpush1.bf16.msra.mxu0 %v599_v21  ;;  %1943 = vmatpush1.bf16.msra.mxu1 %v599_v21 }
  0xad   : > { %v529_v30 = vadd.f32 %v473_v27, %v401_v22  ;;  %v530_v31 = vadd.f32 %v473_v27, %v402_v23  ;;  %v527_v32 = vadd.f32 %v468_v28, %v399_v24  ;;  %v528_v33 = vadd.f32 %v468_v28, %v400_v25  ;;  %1594 = vperm.xlu1 %1991, %v1552_v26   ;;  %v1557_v25 = vld [vmem:[%s2710_s5 + $0x58] sm:$0xff]  ;;  %v1916_v28 = vld [vmem:[%s2709_s4 + $0x168] sm:$0xff] }
  0xae   : > { %1315 = vperm.xlu0 %1990, %v1911_v29  }
  0xaf   : > { %v561_v34 = vmax.f32 %v529_v30, 0.0  ;;  %v562_v35 = vmax.f32 %v530_v31, 0.0  ;;  %v559_v36 = vmax.f32 %v527_v32, 0.0  ;;  %v560_v37 = vmax.f32 %v528_v33, 0.0 }
  0xb0   : > { %v344_v39 = vpop.permute.xlu1 %343  ;;  %v339_v40 = vpop.permute.xlu0 %338 }
  0xb1   : > { %1599 = vperm.xlu1 %1991, %v1553_v38   ;;  %v602_v42 = vpack.c.bf16 %v562_v35, %v560_v37  ;;  %v601_v43 = vpack.c.bf16 %v561_v34, %v559_v36  ;;  %v405_v44 = vmul.f32 %v2387_v7, %v344_v39  ;;  %v406_v45 = vmul.f32 %v2391_v8, %v344_v39  ;;  %v1558_v35 = vld [vmem:[%s2710_s5 + $0x60] sm:$0xff]  ;;  %v1917_v38 = vld [vmem:[%s2709_s4 + $0x170] sm:$0xff] }
  0xb2   : > { %v403_v46 = vmul.f32 %v2387_v7, %v339_v40  ;;  %v404_v47 = vmul.f32 %v2391_v8, %v339_v40  ;;  %1320 = vperm.xlu0 %1990, %v1912_v41  }
  0xb3   : > { %761 = vmatprep.subr.bf16.mxu0 %v602_v42  ;;  %1936 = vmatprep.subr.bf16.mxu1 %v602_v42 }
  0xb4   : > { %v483_v49 = vpop.permute.xlu1 %482  ;;  %v478_v50 = vpop.permute.xlu0 %477  ;;  %762 = vmatpush1.bf16.msra.mxu0 %v601_v43  ;;  %1944 = vmatpush1.bf16.msra.mxu1 %v601_v43 }
  0xb5   : > { %v533_v52 = vadd.f32 %v483_v49, %v405_v44  ;;  %v534_v53 = vadd.f32 %v483_v49, %v406_v45  ;;  %v531_v54 = vadd.f32 %v478_v50, %v403_v46  ;;  %v532_v55 = vadd.f32 %v478_v50, %v404_v47  ;;  %1604 = vperm.xlu1 %1991, %v1554_v48   ;;  %v1559_v47 = vld [vmem:[%s2710_s5 + $0x68] sm:$0xff]  ;;  %v1918_v50 = vld [vmem:[%s2709_s4 + $0x178] sm:$0xff] }
  0xb6   : > { %1325 = vperm.xlu0 %1990, %v1913_v51  }
  0xb7   : > { %v565_v56 = vmax.f32 %v533_v52, 0.0  ;;  %v566_v57 = vmax.f32 %v534_v53, 0.0  ;;  %v563_v58 = vmax.f32 %v531_v54, 0.0  ;;  %v564_v59 = vmax.f32 %v532_v55, 0.0 }
  0xb8   : > { %v354_v62 = vpop.permute.xlu1 %353  ;;  %v349_v63 = vpop.permute.xlu0 %348 }
  0xb9   : > { %1609 = vperm.xlu1 %1991, %v1555_v60   ;;  %v604_v3 = vpack.c.bf16 %v566_v57, %v564_v59  ;;  %v603_v6 = vpack.c.bf16 %v565_v56, %v563_v58  ;;  %v409_v9 = vmul.f32 %v2387_v7, %v354_v62  ;;  %v410_v10 = vmul.f32 %v2391_v8, %v354_v62  ;;  %v1561_v57 = vld [vmem:[%s2710_s5 + $0x78] sm:$0xff]  ;;  %v1560_v60 = vld [vmem:[%s2710_s5 + $0x70] sm:$0xff] }
  0xba   : > { %v407_v11 = vmul.f32 %v2387_v7, %v349_v63  ;;  %v408_v12 = vmul.f32 %v2391_v8, %v349_v63  ;;  %1330 = vperm.xlu0 %1990, %v1914_v1  }
  0xbb   : > { %763 = vmatprep.subr.bf16.mxu0 %v604_v3  ;;  %1937 = vmatprep.subr.bf16.mxu1 %v604_v3 }
  0xbc   : > { %v493_v14 = vpop.permute.xlu1 %492  ;;  %v488_v15 = vpop.permute.xlu0 %487  ;;  %764 = vmatpush1.bf16.msra.mxu0 %v603_v6  ;;  %1945 = vmatpush1.bf16.msra.mxu1 %v603_v6 }
  0xbd   : > { %v537_v17 = vadd.f32 %v493_v14, %v409_v9  ;;  %v538_v18 = vadd.f32 %v493_v14, %v410_v10  ;;  %v535_v19 = vadd.f32 %v488_v15, %v407_v11  ;;  %v536_v20 = vadd.f32 %v488_v15, %v408_v12  ;;  %1614 = vperm.xlu1 %1991, %v1556_v13   ;;  %v1992_v12 = vld [vmem:[%s2708_s3] sm:$0xff]   ;;  %v1994_v14 = vld [vmem:[%s2708_s3 + $0x8] sm:$0xff]  }
  0xbe   : > { %1335 = vperm.xlu0 %1990, %v1915_v16   ;;  %v1993_v13 = vld [vmem:[%s2708_s3 + $0x20] sm:$0xff]   ;;  %v1995_v15 = vld [vmem:[%s2708_s3 + $0x28] sm:$0xff]   ;;  %v1996_v16 = vld [vmem:[%s2708_s3 + $0x10] sm:$0xff]  }
  0xbf   : > { %v569_v21 = vmax.f32 %v537_v17, 0.0  ;;  %v570_v22 = vmax.f32 %v538_v18, 0.0  ;;  %v567_v23 = vmax.f32 %v535_v19, 0.0  ;;  %v568_v24 = vmax.f32 %v536_v20, 0.0  ;;  %v1997_v17 = vld [vmem:[%s2708_s3 + $0x30] sm:$0xff]   ;;  %v1998_v18 = vld [vmem:[%s2708_s3 + $0x18] sm:$0xff]  }
  0xc0   : > { %v364_v26 = vpop.permute.xlu1 %363  ;;  %v359_v27 = vpop.permute.xlu0 %358  ;;  %v1999_v19 = vld [vmem:[%s2708_s3 + $0x38] sm:$0xff]  }
  0xc1   : > { %1619 = vperm.xlu1 %1991, %v1557_v25   ;;  %v606_v29 = vpack.c.bf16 %v570_v22, %v568_v24  ;;  %v605_v30 = vpack.c.bf16 %v569_v21, %v567_v23  ;;  %v413_v31 = vmul.f32 %v2387_v7, %v364_v26  ;;  %v414_v32 = vmul.f32 %v2391_v8, %v364_v26 }
  0xc2   : > { %v411_v33 = vmul.f32 %v2387_v7, %v359_v27  ;;  %v412_v34 = vmul.f32 %v2391_v8, %v359_v27  ;;  %1340 = vperm.xlu0 %1990, %v1916_v28  }
  0xc3   : > { %765 = vmatprep.subr.bf16.mxu0 %v606_v29  ;;  %1938 = vmatprep.subr.bf16.mxu1 %v606_v29 }
  0xc4   : > { %v503_v36 = vpop.permute.xlu1 %502  ;;  %v498_v37 = vpop.permute.xlu0 %497  ;;  %766 = vmatpush1.bf16.msra.mxu0 %v605_v30  ;;  %1946 = vmatpush1.bf16.msra.mxu1 %v605_v30 }
  0xc5   : > { %v541_v39 = vadd.f32 %v503_v36, %v413_v31  ;;  %v542_v40 = vadd.f32 %v503_v36, %v414_v32  ;;  %v539_v41 = vadd.f32 %v498_v37, %v411_v33  ;;  %v540_v42 = vadd.f32 %v498_v37, %v412_v34  ;;  %1624 = vperm.xlu1 %1991, %v1558_v35  }
  0xc6   : > { %1345 = vperm.xlu0 %1990, %v1917_v38  }
  0xc7   : > { %v573_v43 = vmax.f32 %v541_v39, 0.0  ;;  %v574_v44 = vmax.f32 %v542_v40, 0.0  ;;  %v571_v45 = vmax.f32 %v539_v41, 0.0  ;;  %v572_v46 = vmax.f32 %v540_v42, 0.0 }
  0xc8   : > { %v374_v48 = vpop.permute.xlu1 %373  ;;  %v369_v49 = vpop.permute.xlu0 %368 }
  0xc9   : > { %1629 = vperm.xlu1 %1991, %v1559_v47   ;;  %v608_v51 = vpack.c.bf16 %v574_v44, %v572_v46  ;;  %v607_v52 = vpack.c.bf16 %v573_v43, %v571_v45  ;;  %v417_v53 = vmul.f32 %v2387_v7, %v374_v48  ;;  %v418_v54 = vmul.f32 %v2391_v8, %v374_v48 }
  0xca   : > { %v415_v55 = vmul.f32 %v2387_v7, %v369_v49  ;;  %v416_v56 = vmul.f32 %v2391_v8, %v369_v49  ;;  %1350 = vperm.xlu0 %1990, %v1918_v50  }
  0xcb   : > { %767 = vmatprep.subr.bf16.mxu0 %v608_v51  ;;  %1939 = vmatprep.subr.bf16.mxu1 %v608_v51 }
  0xcc   : > { %v513_v58 = vpop.permute.xlu1 %512  ;;  %v508_v59 = vpop.permute.xlu0 %507  ;;  %768 = vmatpush1.bf16.msra.mxu0 %v607_v52  ;;  %1947 = vmatpush1.bf16.msra.mxu1 %v607_v52 }
  0xcd   : > { %v545_v62 = vadd.f32 %v513_v58, %v417_v53  ;;  %v546_v63 = vadd.f32 %v513_v58, %v418_v54  ;;  %v543_v1 = vadd.f32 %v508_v59, %v415_v55  ;;  %v544_v3 = vadd.f32 %v508_v59, %v416_v56  ;;  %1639 = vperm.xlu1 %1991, %v1561_v57  }
  0xce   : > { %1634 = vperm.xlu0 %1990, %v1560_v60  }
  0xcf   : > { %v577_v7 = vmax.f32 %v545_v62, 0.0  ;;  %v578_v8 = vmax.f32 %v546_v63, 0.0  ;;  %v575_v6 = vmax.f32 %v543_v1, 0.0  ;;  %v576_v9 = vmax.f32 %v544_v3, 0.0 }
  0xd0   : > { %v635_v20 = vpop.permute.xlu1 %634  ;;  %v630_v21 = vpop.permute.xlu0 %629 }
  0xd1   : > { %v610_v10 = vpack.c.bf16 %v578_v8, %v576_v9  ;;  %v609_v11 = vpack.c.bf16 %v577_v7, %v575_v6 }
  0xd3   : > { %769 = vmatprep.subr.bf16.mxu0 %v610_v10  ;;  %1940 = vmatprep.subr.bf16.mxu1 %v610_v10 }
  0xd4   : > { %770 = vmatpush1.bf16.msra.mxu0 %v609_v11  ;;  %1948 = vmatpush1.bf16.msra.mxu1 %v609_v11  ;;  %v645_v22 = vpop.permute.xlu1 %644  ;;  %v640_v23 = vpop.permute.xlu0 %639 }
  0xd7   : > { %788 = vmatmul.mubr.bf16.vlgmr.msra.gmra.mrb[0].mxu0 %v1992_v12  ;;  %828 = vmatmul.mubr.bf16.vlgmr.msra.gmra.mrb[0].mxu1 %v1993_v13 }
  0xd8   : > { %797 = vmatprep.mubr.bf16.mxu0 %v2083_v2  ;;  %837 = vmatprep.mubr.bf16.mxu1 %v2083_v2  ;;  %v2553_v24 = vpop.permute.xlu1 %654  ;;  %v2555_v25 = vpop.permute.xlu0 %649 }
  0xdc   : > { %v2557_v26 = vpop.permute.xlu1 %664  ;;  %v2559_v27 = vpop.permute.xlu0 %659 }
  0xdf   : > { %798 = vmatmul.mubr.bf16.gmra.mrb[4].mxu0 %v1994_v14  ;;  %838 = vmatmul.mubr.bf16.gmra.mrb[4].mxu1 %v1995_v15 }
  0xe0   : > { %807 = vmatprep.mubr.bf16.mxu0 %v2083_v2  ;;  %847 = vmatprep.mubr.bf16.mxu1 %v2083_v2  ;;  %v675_v28 = vpop.permute.xlu1 %674  ;;  %v670_v29 = vpop.permute.xlu0 %669 }
  0xe4   : > { %v685_v54 = vpop.permute.xlu1 %684  ;;  %v680_v55 = vpop.permute.xlu0 %679 }
  0xe7   : > { %808 = vmatmul.mubr.bf16.gmra.mrb[8].mxu0 %v1996_v16  ;;  %848 = vmatmul.mubr.bf16.gmra.mrb[8].mxu1 %v1997_v17 }
  0xe8   : > { %817 = vmatprep.mubr.bf16.mxu0 %v2083_v2  ;;  %857 = vmatprep.mubr.bf16.mxu1 %v2083_v2 }
  0xef   : > { %818 = vmatmul.mubr.bf16.gmra.mrb[12].mxu0 %v1998_v18  ;;  %858 = vmatmul.mubr.bf16.gmra.mrb[12].mxu1 %v1999_v19 }
  0xf0   : > { %1110 = vmatprep.mubr.bf16.mxu1 %v2083_v2  ;;  %1433 = vmatprep.mubr.bf16.mxu0 %v2083_v2 }
 0x1aa   : > { %v789_v30 = vpop.f32.mrb[0].mxu0  ;;  %v829_v31 = vpop.f32.mrb[0].mxu1 }
 0x1ab   : > { %v790_v32 = vadd.f32 %v789_v30, %v630_v21  ;;  %v830_v33 = vadd.f32 %v829_v31, %v670_v29  ;;  %v791_v34 = vpop.f32.mrb[1].mxu0  ;;  %v831_v35 = vpop.f32.mrb[1].mxu1 }
 0x1ac   : > { %v792_v36 = vadd.f32 %v791_v34, %v630_v21  ;;  %v832_v37 = vadd.f32 %v831_v35, %v670_v29  ;;  %v793_v38 = vpop.f32.mrb[2].mxu0  ;;  %v833_v39 = vpop.f32.mrb[2].mxu1 }
 0x1ad   : > { %v794_v40 = vadd.f32 %v793_v38, %v635_v20  ;;  %v834_v41 = vadd.f32 %v833_v39, %v675_v28  ;;  %v795_v42 = vpop.f32.mrb[3].mxu0  ;;  %v835_v43 = vpop.f32.mrb[3].mxu1  ;;  %v868_v46 = vmax.f32 %v790_v32, 0.0  ;;  %v884_v47 = vmax.f32 %v830_v33, 0.0 }
 0x1ae   : > { %v796_v44 = vadd.f32 %v795_v42, %v635_v20  ;;  %v836_v45 = vadd.f32 %v835_v43, %v675_v28  ;;  %v869_v50 = vmax.f32 %v792_v36, 0.0  ;;  %v885_v51 = vmax.f32 %v832_v37, 0.0  ;;  %v690_v31 = vpop.permute.xlu0 %689 }
 0x1af   : > { %v870_v48 = vmax.f32 %v794_v40, 0.0  ;;  %v886_v49 = vmax.f32 %v834_v41, 0.0 }
 0x1b0   : > { %v871_v52 = vmax.f32 %v796_v44, 0.0  ;;  %v887_v53 = vmax.f32 %v836_v45, 0.0 }
 0x1b1   : > { %v917_v56 = vpack.c.bf16 %v870_v48, %v868_v46  ;;  %v2561_v57 = vpack.c.bf16 %v886_v49, %v884_v47 }
 0x1b2   : > { %v918_v58 = vpack.c.bf16 %v871_v52, %v869_v50  ;;  %v2563_v59 = vpack.c.bf16 %v887_v53, %v885_v51  ;;  %v799_v60 = vpop.f32.mrb[4].mxu0  ;;  %v839_v62 = vpop.f32.mrb[4].mxu1 }
 0x1b3   : > { %v800_v63 = vadd.f32 %v799_v60, %v640_v23  ;;  %v840_v1 = vadd.f32 %v839_v62, %v680_v55  ;;  %v801_v3 = vpop.f32.mrb[5].mxu0  ;;  %v841_v7 = vpop.f32.mrb[5].mxu1 }
 0x1b4   : > { %v802_v8 = vadd.f32 %v801_v3, %v640_v23  ;;  %v842_v6 = vadd.f32 %v841_v7, %v680_v55  ;;  %v803_v9 = vpop.f32.mrb[6].mxu0  ;;  %v843_v10 = vpop.f32.mrb[6].mxu1  ;;  %1078 = vmatprep.subr.bf16.mxu1 %v918_v58 }
 0x1b5   : > { %v804_v11 = vadd.f32 %v803_v9, %v645_v22  ;;  %v844_v12 = vadd.f32 %v843_v10, %v685_v54  ;;  %v805_v13 = vpop.f32.mrb[7].mxu0  ;;  %v845_v14 = vpop.f32.mrb[7].mxu1  ;;  %1079 = vmatpush1.bf16.msra.mxu1 %v917_v56  ;;  %v872_v17 = vmax.f32 %v800_v63, 0.0  ;;  %v888_v18 = vmax.f32 %v840_v1, 0.0 }
 0x1b6   : > { %v806_v15 = vadd.f32 %v805_v13, %v645_v22  ;;  %v846_v16 = vadd.f32 %v845_v14, %v685_v54  ;;  %v873_v21 = vmax.f32 %v802_v8, 0.0  ;;  %v889_v28 = vmax.f32 %v842_v6, 0.0  ;;  %v695_v23 = vpop.permute.xlu1 %694  ;;  %v700_v62 = vpop.permute.xlu0 %699 }
 0x1b7   : > { %v874_v19 = vmax.f32 %v804_v11, 0.0  ;;  %v890_v20 = vmax.f32 %v844_v12, 0.0 }
 0x1b8   : > { %v875_v29 = vmax.f32 %v806_v15, 0.0  ;;  %v891_v30 = vmax.f32 %v846_v16, 0.0 }
 0x1b9   : > { %v919_v32 = vpack.c.bf16 %v874_v19, %v872_v17  ;;  %v2565_v33 = vpack.c.bf16 %v890_v20, %v888_v18 }
 0x1ba   : > { %v920_v34 = vpack.c.bf16 %v875_v29, %v873_v21  ;;  %v2567_v35 = vpack.c.bf16 %v891_v30, %v889_v28  ;;  %v809_v36 = vpop.f32.mrb[8].mxu0  ;;  %v849_v37 = vpop.f32.mrb[8].mxu1 }
 0x1bb   : > { %v810_v22 = vadd.f32 %v809_v36, %v2555_v25  ;;  %v850_v38 = vadd.f32 %v849_v37, %v690_v31  ;;  %v811_v39 = vpop.f32.mrb[9].mxu0  ;;  %v851_v40 = vpop.f32.mrb[9].mxu1 }
 0x1bc   : > { %v812_v41 = vadd.f32 %v811_v39, %v2555_v25  ;;  %v852_v42 = vadd.f32 %v851_v40, %v690_v31  ;;  %v813_v43 = vpop.f32.mrb[10].mxu0  ;;  %v853_v44 = vpop.f32.mrb[10].mxu1  ;;  %1080 = vmatprep.subr.bf16.mxu1 %v920_v34  ;;  %v2005_v39 = vld [vmem:[%s2708_s3 + $0x68] sm:$0xff]   ;;  %v2006_v40 = vld [vmem:[%s2708_s3 + $0x70] sm:$0xff]  }
 0x1bd   : > { %v814_v45 = vadd.f32 %v813_v43, %v2553_v24  ;;  %v854_v46 = vadd.f32 %v853_v44, %v695_v23  ;;  %v815_v47 = vpop.f32.mrb[11].mxu0  ;;  %v855_v48 = vpop.f32.mrb[11].mxu1  ;;  %1081 = vmatpush1.bf16.msra.mxu1 %v919_v32  ;;  %v876_v51 = vmax.f32 %v810_v22, 0.0  ;;  %v892_v52 = vmax.f32 %v850_v38, 0.0 }
 0x1be   : > { %v816_v49 = vadd.f32 %v815_v47, %v2553_v24  ;;  %v856_v50 = vadd.f32 %v855_v48, %v695_v23  ;;  %v877_v55 = vmax.f32 %v812_v41, 0.0  ;;  %v893_v56 = vmax.f32 %v852_v42, 0.0  ;;  %v705_v60 = vpop.permute.xlu1 %704  ;;  %v2007_v41 = vld [vmem:[%s2708_s3 + $0x78] sm:$0xff]   ;;  %v953_v42 = vpop.permute.xlu0 %952 }
 0x1bf   : > { %v878_v53 = vmax.f32 %v814_v45, 0.0  ;;  %v894_v54 = vmax.f32 %v854_v46, 0.0 }
 0x1c0   : > { %v879_v25 = vmax.f32 %v816_v49, 0.0  ;;  %v895_v58 = vmax.f32 %v856_v50, 0.0 }
 0x1c1   : > { %v921_v63 = vpack.c.bf16 %v878_v53, %v876_v51  ;;  %v929_v1 = vpack.c.bf16 %v894_v54, %v892_v52 }
 0x1c2   : > { %v922_v3 = vpack.c.bf16 %v879_v25, %v877_v55  ;;  %v930_v7 = vpack.c.bf16 %v895_v58, %v893_v56  ;;  %v819_v8 = vpop.f32.mrb[12].mxu0  ;;  %v859_v6 = vpop.f32.mrb[12].mxu1 }
 0x1c3   : > { %v820_v9 = vadd.f32 %v819_v8, %v2559_v27  ;;  %v860_v24 = vadd.f32 %v859_v6, %v700_v62  ;;  %v821_v10 = vpop.f32.mrb[13].mxu0  ;;  %v861_v11 = vpop.f32.mrb[13].mxu1 }
 0x1c4   : > { %v822_v12 = vadd.f32 %v821_v10, %v2559_v27  ;;  %v862_v13 = vadd.f32 %v861_v11, %v700_v62  ;;  %v823_v14 = vpop.f32.mrb[14].mxu0  ;;  %v863_v15 = vpop.f32.mrb[14].mxu1  ;;  %1082 = vmatprep.subr.bf16.mxu1 %v922_v3 }
 0x1c5   : > { %v824_v16 = vadd.f32 %v823_v14, %v2557_v26  ;;  %v864_v17 = vadd.f32 %v863_v15, %v705_v60  ;;  %v825_v18 = vpop.f32.mrb[15].mxu0  ;;  %v865_v19 = vpop.f32.mrb[15].mxu1  ;;  %1083 = vmatpush1.bf16.msra.mxu1 %v921_v63  ;;  %v880_v28 = vmax.f32 %v820_v9, 0.0  ;;  %v896_v29 = vmax.f32 %v860_v24, 0.0 }
 0x1c6   : > { %v826_v20 = vadd.f32 %v825_v18, %v2557_v26  ;;  %v866_v21 = vadd.f32 %v865_v19, %v705_v60  ;;  %v881_v31 = vmax.f32 %v822_v12, 0.0  ;;  %v897_v32 = vmax.f32 %v862_v13, 0.0  ;;  %v2000_v26 = vld [vmem:[%s2708_s3 + $0x40] sm:$0xff]   ;;  %v958_v46 = vpop.permute.xlu1 %957  ;;  %v963_v25 = vpop.permute.xlu0 %962 }
 0x1c7   : > { %v882_v30 = vmax.f32 %v824_v16, 0.0  ;;  %v898_v23 = vmax.f32 %v864_v17, 0.0 }
 0x1c8   : > { %v883_v27 = vmax.f32 %v826_v20, 0.0  ;;  %v899_v34 = vmax.f32 %v866_v21, 0.0 }
 0x1c9   : > { %v923_v36 = vpack.c.bf16 %v882_v30, %v880_v28  ;;  %v931_v37 = vpack.c.bf16 %v898_v23, %v896_v29 }
 0x1ca   : > { %v924_v22 = vpack.c.bf16 %v883_v27, %v881_v31  ;;  %v932_v38 = vpack.c.bf16 %v899_v34, %v897_v32  ;;  %v973_v14 = vpop.permute.xlu0 %972 }
 0x1cc   : > { %1084 = vmatprep.subr.bf16.mxu1 %v924_v22 }
 0x1cd   : > { %1085 = vmatpush1.bf16.msra.mxu1 %v923_v36 }
 0x1ce   : > { %1086 = vmatprep.subr.bf16.mxu1 %v2563_v59  ;;  %v2001_v59 = vld [vmem:[%s2708_s3 + $0x48] sm:$0xff]   ;;  %v983_v36 = vpop.permute.xlu0 %982 }
 0x1d1   : > { %1087 = vmatpush1.bf16.msra.mxu1 %v2561_v57  ;;  %v2002_v57 = vld [vmem:[%s2708_s3 + $0x50] sm:$0xff]  }
 0x1d2   : > { %1088 = vmatprep.subr.bf16.mxu1 %v2567_v35  ;;  %v2004_v35 = vld [vmem:[%s2708_s3 + $0x60] sm:$0xff]  }
 0x1d5   : > { %1089 = vmatpush1.bf16.msra.mxu1 %v2565_v33  ;;  %v2003_v33 = vld [vmem:[%s2708_s3 + $0x58] sm:$0xff]  }
 0x1d6   : > { %1090 = vmatprep.subr.bf16.mxu1 %v930_v7 }
 0x1d9   : > { %1091 = vmatpush1.bf16.msra.mxu1 %v929_v1  ;;  %v968_v1 = vpop.permute.xlu1 %967 }
 0x1da   : > { %1092 = vmatprep.subr.bf16.mxu1 %v932_v38 }
 0x1dd   : > { %1093 = vmatpush1.bf16.msra.mxu1 %v931_v37  ;;  %v978_v19 = vpop.permute.xlu1 %977 }
 0x1e0   : > { %1111 = vmatmul.mubr.bf16.vlgmr.msra.gmra.mrb[16].mxu1 %v2000_v26 }
 0x1e1   : > { %1120 = vmatprep.mubr.bf16.mxu1 %v2083_v2 }
 0x1e8   : > { %1121 = vmatmul.mubr.bf16.gmra.mrb[20].mxu1 %v2001_v59  ;;  %v988_v59 = vpop.permute.xlu1 %987 }
 0x1e9   : > { %1130 = vmatprep.mubr.bf16.mxu1 %v2083_v2 }
 0x1f0   : > { %1131 = vmatmul.mubr.bf16.gmra.mrb[24].mxu1 %v2002_v57 }
 0x1f1   : > { %1140 = vmatprep.mubr.bf16.mxu1 %v2083_v2 }
 0x1f8   : > { %1141 = vmatmul.mubr.bf16.gmra.mrb[28].mxu1 %v2003_v33 }
 0x1f9   : > { %1150 = vmatprep.mubr.bf16.mxu1 %v2083_v2 }
 0x200   : > { %1151 = vmatmul.mubr.bf16.gmra.mrb[32].mxu1 %v2004_v35 }
 0x201   : > { %1160 = vmatprep.mubr.bf16.mxu1 %v2083_v2 }
 0x208   : > { %1161 = vmatmul.mubr.bf16.gmra.mrb[36].mxu1 %v2005_v39 }
 0x209   : > { %1170 = vmatprep.mubr.bf16.mxu1 %v2083_v2 }
 0x210   : > { %1171 = vmatmul.mubr.bf16.gmra.mrb[40].mxu1 %v2006_v40 }
 0x211   : > { %1180 = vmatprep.mubr.bf16.mxu1 %v2083_v2 }
 0x218   : > { %1181 = vmatmul.mubr.bf16.gmra.mrb[44].mxu1 %v2007_v41 }
 0x2b3   : > { %v1112_v43 = vpop.f32.mrb[16].mxu1 }
 0x2b4   : > { %v1113_v44 = vadd.f32 %v1112_v43, %v953_v42  ;;  %v1114_v45 = vpop.f32.mrb[17].mxu1 }
 0x2b5   : > { %v1115_v47 = vadd.f32 %v1114_v45, %v953_v42  ;;  %v1116_v48 = vpop.f32.mrb[18].mxu1 }
 0x2b6   : > { %v1117_v49 = vadd.f32 %v1116_v48, %v958_v46  ;;  %v1118_v50 = vpop.f32.mrb[19].mxu1  ;;  %v1191_v52 = vmax.f32 %v1113_v44, 0.0 }
 0x2b7   : > { %v1119_v51 = vadd.f32 %v1118_v50, %v958_v46  ;;  %v1192_v54 = vmax.f32 %v1115_v47, 0.0  ;;  %v993_v46 = vpop.permute.xlu0 %992 }
 0x2b8   : > { %v1193_v53 = vmax.f32 %v1117_v49, 0.0 }
 0x2b9   : > { %v1194_v55 = vmax.f32 %v1119_v51, 0.0  ;;  %v998_v51 = vpop.permute.xlu1 %997 }
 0x2ba   : > { %v1240_v56 = vpack.c.bf16 %v1193_v53, %v1191_v52 }
 0x2bb   : > { %v1241_v58 = vpack.c.bf16 %v1194_v55, %v1192_v54  ;;  %v1122_v60 = vpop.f32.mrb[20].mxu1 }
 0x2bc   : > { %v1123_v62 = vadd.f32 %v1122_v60, %v963_v25  ;;  %v1124_v63 = vpop.f32.mrb[21].mxu1 }
 0x2bd   : > { %v1125_v3 = vadd.f32 %v1124_v63, %v963_v25  ;;  %v1126_v7 = vpop.f32.mrb[22].mxu1  ;;  %1401 = vmatprep.subr.bf16.mxu0 %v1241_v58 }
 0x2be   : > { %v1127_v8 = vadd.f32 %v1126_v7, %v968_v1  ;;  %v1128_v6 = vpop.f32.mrb[23].mxu1  ;;  %1402 = vmatpush1.bf16.msra.mxu0 %v1240_v56  ;;  %v1195_v24 = vmax.f32 %v1123_v62, 0.0 }
 0x2bf   : > { %v1129_v9 = vadd.f32 %v1128_v6, %v968_v1  ;;  %v1196_v11 = vmax.f32 %v1125_v3, 0.0  ;;  %v1003_v1 = vpop.permute.xlu0 %1002 }
 0x2c0   : > { %v1197_v10 = vmax.f32 %v1127_v8, 0.0 }
 0x2c1   : > { %v1198_v12 = vmax.f32 %v1129_v9, 0.0  ;;  %v1008_v9 = vpop.permute.xlu1 %1007 }
 0x2c2   : > { %v1242_v13 = vpack.c.bf16 %v1197_v10, %v1195_v24 }
 0x2c3   : > { %v1243_v15 = vpack.c.bf16 %v1198_v12, %v1196_v11  ;;  %v1132_v16 = vpop.f32.mrb[24].mxu1 }
 0x2c4   : > { %v1133_v17 = vadd.f32 %v1132_v16, %v973_v14  ;;  %v1134_v18 = vpop.f32.mrb[25].mxu1 }
 0x2c5   : > { %v1135_v20 = vadd.f32 %v1134_v18, %v973_v14  ;;  %v1136_v21 = vpop.f32.mrb[26].mxu1  ;;  %1403 = vmatprep.subr.bf16.mxu0 %v1243_v15 }
 0x2c6   : > { %v1137_v28 = vadd.f32 %v1136_v21, %v978_v19  ;;  %v1138_v29 = vpop.f32.mrb[27].mxu1  ;;  %1404 = vmatpush1.bf16.msra.mxu0 %v1242_v13  ;;  %v1199_v23 = vmax.f32 %v1133_v17, 0.0 }
 0x2c7   : > { %v1139_v30 = vadd.f32 %v1138_v29, %v978_v19  ;;  %v1200_v32 = vmax.f32 %v1135_v20, 0.0  ;;  %v1013_v19 = vpop.permute.xlu0 %1012 }
 0x2c8   : > { %v1201_v31 = vmax.f32 %v1137_v28, 0.0 }
 0x2c9   : > { %v1202_v27 = vmax.f32 %v1139_v30, 0.0  ;;  %v1018_v30 = vpop.permute.xlu1 %1017 }
 0x2ca   : > { %v1244_v34 = vpack.c.bf16 %v1201_v31, %v1199_v23 }
 0x2cb   : > { %v1245_v37 = vpack.c.bf16 %v1202_v27, %v1200_v32  ;;  %v1142_v22 = vpop.f32.mrb[28].mxu1 }
 0x2cc   : > { %v1143_v38 = vadd.f32 %v1142_v22, %v983_v36  ;;  %v1144_v26 = vpop.f32.mrb[29].mxu1 }
 0x2cd   : > { %v1145_v57 = vadd.f32 %v1144_v26, %v983_v36  ;;  %v1146_v33 = vpop.f32.mrb[30].mxu1  ;;  %1405 = vmatprep.subr.bf16.mxu0 %v1245_v37 }
 0x2ce   : > { %v1147_v35 = vadd.f32 %v1146_v33, %v988_v59  ;;  %v1148_v39 = vpop.f32.mrb[31].mxu1  ;;  %1406 = vmatpush1.bf16.msra.mxu0 %v1244_v34  ;;  %v1203_v41 = vmax.f32 %v1143_v38, 0.0 }
 0x2cf   : > { %v1149_v40 = vadd.f32 %v1148_v39, %v988_v59  ;;  %v1204_v43 = vmax.f32 %v1145_v57, 0.0  ;;  %v1023_v59 = vpop.permute.xlu0 %1022 }
 0x2d0   : > { %v1205_v42 = vmax.f32 %v1147_v35, 0.0 }
 0x2d1   : > { %v1206_v44 = vmax.f32 %v1149_v40, 0.0  ;;  %v1028_v40 = vpop.permute.xlu1 %1027 }
 0x2d2   : > { %v1246_v45 = vpack.c.bf16 %v1205_v42, %v1203_v41 }
 0x2d3   : > { %v1247_v47 = vpack.c.bf16 %v1206_v44, %v1204_v43  ;;  %v1152_v48 = vpop.f32.mrb[32].mxu1 }
 0x2d4   : > { %v1153_v49 = vadd.f32 %v1152_v48, %v993_v46  ;;  %v1154_v50 = vpop.f32.mrb[33].mxu1 }
 0x2d5   : > { %v1155_v52 = vadd.f32 %v1154_v50, %v993_v46  ;;  %v1156_v53 = vpop.f32.mrb[34].mxu1  ;;  %1407 = vmatprep.subr.bf16.mxu0 %v1247_v47 }
 0x2d6   : > { %v1157_v54 = vadd.f32 %v1156_v53, %v998_v51  ;;  %v1158_v55 = vpop.f32.mrb[35].mxu1  ;;  %1408 = vmatpush1.bf16.msra.mxu0 %v1246_v45  ;;  %v1207_v25 = vmax.f32 %v1153_v49, 0.0  ;;  %v2009_v53 = vld [vmem:[%s2708_s3 + $0x88] sm:$0xff]  }
 0x2d7   : > { %v1159_v56 = vadd.f32 %v1158_v55, %v998_v51  ;;  %v1208_v60 = vmax.f32 %v1155_v52, 0.0  ;;  %v2008_v52 = vld [vmem:[%s2708_s3 + $0x80] sm:$0xff]   ;;  %v2011_v55 = vld [vmem:[%s2708_s3 + $0x98] sm:$0xff]  }
 0x2d8   : > { %v1209_v58 = vmax.f32 %v1157_v54, 0.0  ;;  %v2010_v54 = vld [vmem:[%s2708_s3 + $0x90] sm:$0xff]  }
 0x2d9   : > { %v1210_v62 = vmax.f32 %v1159_v56, 0.0  ;;  %v2012_v56 = vld [vmem:[%s2708_s3 + $0xa0] sm:$0xff]  }
 0x2da   : > { %v1248_v63 = vpack.c.bf16 %v1209_v58, %v1207_v25  ;;  %v2013_v25 = vld [vmem:[%s2708_s3 + $0xa8] sm:$0xff]   ;;  %v2014_v58 = vld [vmem:[%s2708_s3 + $0xb0] sm:$0xff]  }
 0x2db   : > { %v1249_v3 = vpack.c.bf16 %v1210_v62, %v1208_v60  ;;  %v1162_v7 = vpop.f32.mrb[36].mxu1  ;;  %v2015_v60 = vld [vmem:[%s2708_s3 + $0xb8] sm:$0xff]   ;;  %v1281_v62 = vpop.permute.xlu1 %1280 }
 0x2dc   : > { %v1163_v8 = vadd.f32 %v1162_v7, %v1003_v1  ;;  %v1164_v6 = vpop.f32.mrb[37].mxu1 }
 0x2dd   : > { %v1165_v24 = vadd.f32 %v1164_v6, %v1003_v1  ;;  %v1166_v10 = vpop.f32.mrb[38].mxu1  ;;  %1409 = vmatprep.subr.bf16.mxu0 %v1249_v3 }
 0x2de   : > { %v1167_v11 = vadd.f32 %v1166_v10, %v1008_v9  ;;  %v1168_v12 = vpop.f32.mrb[39].mxu1  ;;  %1410 = vmatpush1.bf16.msra.mxu0 %v1248_v63  ;;  %v1211_v14 = vmax.f32 %v1163_v8, 0.0  ;;  %v1276_v63 = vpop.permute.xlu0 %1275 }
 0x2df   : > { %v1169_v13 = vadd.f32 %v1168_v12, %v1008_v9  ;;  %v1212_v16 = vmax.f32 %v1165_v24, 0.0  ;;  %v1291_v1 = vpop.permute.xlu1 %1290 }
 0x2e0   : > { %v1213_v15 = vmax.f32 %v1167_v11, 0.0 }
 0x2e1   : > { %v1214_v17 = vmax.f32 %v1169_v13, 0.0 }
 0x2e2   : > { %v1250_v18 = vpack.c.bf16 %v1213_v15, %v1211_v14  ;;  %v1286_v3 = vpop.permute.xlu0 %1285 }
 0x2e3   : > { %v1251_v20 = vpack.c.bf16 %v1214_v17, %v1212_v16  ;;  %v1172_v21 = vpop.f32.mrb[40].mxu1  ;;  %v1570_v7 = vpop.permute.xlu1 %1569 }
 0x2e4   : > { %v1173_v28 = vadd.f32 %v1172_v21, %v1013_v19  ;;  %v1174_v29 = vpop.f32.mrb[41].mxu1 }
 0x2e5   : > { %v1175_v23 = vadd.f32 %v1174_v29, %v1013_v19  ;;  %v1176_v31 = vpop.f32.mrb[42].mxu1  ;;  %1411 = vmatprep.subr.bf16.mxu0 %v1251_v20 }
 0x2e6   : > { %v1177_v32 = vadd.f32 %v1176_v31, %v1018_v30  ;;  %v1178_v27 = vpop.f32.mrb[43].mxu1  ;;  %1412 = vmatpush1.bf16.msra.mxu0 %v1250_v18  ;;  %v1215_v36 = vmax.f32 %v1173_v28, 0.0  ;;  %v1565_v8 = vpop.permute.xlu0 %1564 }
 0x2e7   : > { %v1179_v34 = vadd.f32 %v1178_v27, %v1018_v30  ;;  %v1216_v22 = vmax.f32 %v1175_v23, 0.0  ;;  %v1575_v6 = vpop.permute.xlu1 %1574 }
 0x2e8   : > { %v1217_v37 = vmax.f32 %v1177_v32, 0.0 }
 0x2e9   : > { %v1218_v38 = vmax.f32 %v1179_v34, 0.0 }
 0x2ea   : > { %v1252_v26 = vpack.c.bf16 %v1217_v37, %v1215_v36  ;;  %v1296_v9 = vpop.permute.xlu0 %1295 }
 0x2eb   : > { %v1253_v57 = vpack.c.bf16 %v1218_v38, %v1216_v22  ;;  %v1182_v33 = vpop.f32.mrb[44].mxu1  ;;  %v1580_v24 = vpop.permute.xlu1 %1579 }
 0x2ec   : > { %v1183_v35 = vadd.f32 %v1182_v33, %v1023_v59  ;;  %v1184_v39 = vpop.f32.mrb[45].mxu1 }
 0x2ed   : > { %v1185_v41 = vadd.f32 %v1184_v39, %v1023_v59  ;;  %v1186_v42 = vpop.f32.mrb[46].mxu1  ;;  %1413 = vmatprep.subr.bf16.mxu0 %v1253_v57 }
 0x2ee   : > { %v1187_v43 = vadd.f32 %v1186_v42, %v1028_v40  ;;  %v1188_v44 = vpop.f32.mrb[47].mxu1  ;;  %1414 = vmatpush1.bf16.msra.mxu0 %v1252_v26  ;;  %v1219_v46 = vmax.f32 %v1183_v35, 0.0  ;;  %v1301_v10 = vpop.permute.xlu0 %1300 }
 0x2ef   : > { %v1189_v45 = vadd.f32 %v1188_v44, %v1028_v40  ;;  %v1220_v48 = vmax.f32 %v1185_v41, 0.0  ;;  %v1585_v11 = vpop.permute.xlu1 %1584 }
 0x2f0   : > { %v1221_v47 = vmax.f32 %v1187_v43, 0.0 }
 0x2f1   : > { %v1222_v49 = vmax.f32 %v1189_v45, 0.0 }
 0x2f2   : > { %v1254_v50 = vpack.c.bf16 %v1221_v47, %v1219_v46  ;;  %v2643_v12 = vpop.permute.xlu0 %1305 }
 0x2f3   : > { %v1255_v51 = vpack.c.bf16 %v1222_v49, %v1220_v48  ;;  %v1590_v28 = vpop.permute.xlu1 %1589 }
 0x2f5   : > { %1415 = vmatprep.subr.bf16.mxu0 %v1255_v51 }
 0x2f6   : > { %1416 = vmatpush1.bf16.msra.mxu0 %v1254_v50  ;;  %v2645_v30 = vpop.permute.xlu0 %1310 }
 0x2f7   : > { %v1595_v33 = vpop.permute.xlu1 %1594 }
 0x2f9   : > { %1434 = vmatmul.mubr.bf16.vlgmr.msra.gmra.mrb[16].mxu0 %v2008_v52 }
 0x2fa   : > { %1443 = vmatprep.mubr.bf16.mxu0 %v2083_v2  ;;  %v1316_v41 = vpop.permute.xlu0 %1315 }
 0x301   : > { %1444 = vmatmul.mubr.bf16.gmra.mrb[20].mxu0 %v2009_v53  ;;  %v1600_v53 = vpop.permute.xlu1 %1599 }
 0x302   : > { %1453 = vmatprep.mubr.bf16.mxu0 %v2083_v2 }
 0x309   : > { %1454 = vmatmul.mubr.bf16.gmra.mrb[24].mxu0 %v2010_v54 }
 0x30a   : > { %1463 = vmatprep.mubr.bf16.mxu0 %v2083_v2 }
 0x311   : > { %1464 = vmatmul.mubr.bf16.gmra.mrb[28].mxu0 %v2011_v55 }
 0x312   : > { %1473 = vmatprep.mubr.bf16.mxu0 %v2083_v2 }
 0x319   : > { %1474 = vmatmul.mubr.bf16.gmra.mrb[32].mxu0 %v2012_v56 }
 0x31a   : > { %1483 = vmatprep.mubr.bf16.mxu0 %v2083_v2 }
 0x321   : > { %1484 = vmatmul.mubr.bf16.gmra.mrb[36].mxu0 %v2013_v25  ;;  %v1321_v25 = vpop.permute.xlu0 %1320 }
 0x322   : > { %1493 = vmatprep.mubr.bf16.mxu0 %v2083_v2 }
 0x329   : > { %1494 = vmatmul.mubr.bf16.gmra.mrb[40].mxu0 %v2014_v58 }
 0x32a   : > { %1503 = vmatprep.mubr.bf16.mxu0 %v2083_v2 }
 0x331   : > { %1504 = vmatmul.mubr.bf16.gmra.mrb[44].mxu0 %v2015_v60 }
 0x3cc   : > { %v1435_v13 = vpop.f32.mrb[16].mxu0 }
 0x3cd   : > { %v1436_v2 = vadd.f32 %v1435_v13, %v1276_v63  ;;  %v1437_v14 = vpop.f32.mrb[17].mxu0 }
 0x3ce   : > { %v1438_v15 = vadd.f32 %v1437_v14, %v1276_v63  ;;  %v1439_v16 = vpop.f32.mrb[18].mxu0 }
 0x3cf   : > { %v1514_v17 = vmax.f32 %v1436_v2, 0.0  ;;  %v1440_v18 = vadd.f32 %v1439_v16, %v1281_v62  ;;  %v1441_v19 = vpop.f32.mrb[19].mxu0 }
 0x3d0   : > { %v1515_v20 = vmax.f32 %v1438_v15, 0.0  ;;  %v1442_v21 = vadd.f32 %v1441_v19, %v1281_v62  ;;  %v1605_v15 = vpop.permute.xlu1 %1604 }
 0x3d1   : > { %v1516_v29 = vmax.f32 %v1440_v18, 0.0  ;;  %v1642_v31 = vmul.f32 %v1565_v8, %v1514_v17  ;;  %v1326_v17 = vpop.permute.xlu0 %1325 }
 0x3d2   : > { %v1517_v23 = vmax.f32 %v1442_v21, 0.0  ;;  %v1643_v27 = vmul.f32 %v1565_v8, %v1515_v20 }
 0x3d3   : > { %v1644_v32 = vmul.f32 %v1570_v7, %v1516_v29 }
 0x3d4   : > { %v1645_v34 = vmul.f32 %v1570_v7, %v1517_v23  ;;  %v1445_v36 = vpop.f32.mrb[20].mxu0 }
 0x3d5   : > { %v1674_v37 = vadd.f32 %v1644_v32, %v1642_v31  ;;  %v1446_v22 = vadd.f32 %v1445_v36, %v1286_v3  ;;  %v1447_v38 = vpop.f32.mrb[21].mxu0 }
 0x3d6   : > { %v1695_v26 = vadd.f32 %v1645_v34, %v1643_v27  ;;  %v1448_v59 = vadd.f32 %v1447_v38, %v1286_v3  ;;  %v1449_v57 = vpop.f32.mrb[22].mxu0 }
 0x3d7   : > { %v1518_v35 = vmax.f32 %v1446_v22, 0.0  ;;  %v1450_v39 = vadd.f32 %v1449_v57, %v1291_v1  ;;  %v1451_v40 = vpop.f32.mrb[23].mxu0 }
 0x3d8   : > { %v1519_v42 = vmax.f32 %v1448_v59, 0.0  ;;  %v1452_v43 = vadd.f32 %v1451_v40, %v1291_v1 }
 0x3d9   : > { %v1646_v44 = vmul.f32 %v1575_v6, %v1518_v35  ;;  %v1520_v45 = vmax.f32 %v1450_v39, 0.0 }
 0x3da   : > { %v1647_v46 = vmul.f32 %v1575_v6, %v1519_v42  ;;  %v1521_v47 = vmax.f32 %v1452_v43, 0.0 }
 0x3db   : > { %v1675_v48 = vadd.f32 %v1674_v37, %v1646_v44  ;;  %v1648_v49 = vmul.f32 %v1580_v24, %v1520_v45  ;;  %v1610_v37 = vpop.permute.xlu1 %1609 }
 0x3dc   : > { %v1696_v50 = vadd.f32 %v1695_v26, %v1647_v46  ;;  %v1649_v51 = vmul.f32 %v1580_v24, %v1521_v47  ;;  %v1455_v52 = vpop.f32.mrb[24].mxu0 }
 0x3dd   : > { %v1676_v54 = vadd.f32 %v1675_v48, %v1648_v49  ;;  %v1456_v55 = vadd.f32 %v1455_v52, %v1296_v9  ;;  %v1457_v56 = vpop.f32.mrb[25].mxu0 }
 0x3de   : > { %v1697_v58 = vadd.f32 %v1696_v50, %v1649_v51  ;;  %v1458_v60 = vadd.f32 %v1457_v56, %v1296_v9  ;;  %v1459_v62 = vpop.f32.mrb[26].mxu0 }
 0x3df   : > { %v1522_v63 = vmax.f32 %v1456_v55, 0.0  ;;  %v1460_v3 = vadd.f32 %v1459_v62, %v1301_v10  ;;  %v1461_v1 = vpop.f32.mrb[27].mxu0  ;;  %v1615_v48 = vpop.permute.xlu1 %1614 }
 0x3e0   : > { %v1523_v7 = vmax.f32 %v1458_v60, 0.0  ;;  %v1462_v8 = vadd.f32 %v1461_v1, %v1301_v10 }
 0x3e1   : > { %v1650_v6 = vmul.f32 %v1585_v11, %v1522_v63  ;;  %v1524_v13 = vmax.f32 %v1460_v3, 0.0 }
 0x3e2   : > { %v1651_v2 = vmul.f32 %v1585_v11, %v1523_v7  ;;  %v1525_v14 = vmax.f32 %v1462_v8, 0.0 }
 0x3e3   : > { %v1677_v24 = vadd.f32 %v1676_v54, %v1650_v6  ;;  %v1652_v16 = vmul.f32 %v1590_v28, %v1524_v13  ;;  %v1620_v1 = vpop.permute.xlu1 %1619 }
 0x3e4   : > { %v1698_v18 = vadd.f32 %v1697_v58, %v1651_v2  ;;  %v1653_v19 = vmul.f32 %v1590_v28, %v1525_v14  ;;  %v1465_v20 = vpop.f32.mrb[28].mxu0  ;;  %v1331_v28 = vpop.permute.xlu0 %1330 }
 0x3e5   : > { %v1678_v21 = vadd.f32 %v1677_v24, %v1652_v16  ;;  %v1466_v9 = vadd.f32 %v1465_v20, %v2643_v12  ;;  %v1467_v29 = vpop.f32.mrb[29].mxu0 }
 0x3e6   : > { %v1699_v23 = vadd.f32 %v1698_v18, %v1653_v19  ;;  %v1468_v31 = vadd.f32 %v1467_v29, %v2643_v12  ;;  %v1469_v32 = vpop.f32.mrb[30].mxu0  ;;  %v2018_v19 = vld [vmem:[%s2374_s22] sm:$0x3]  ;;  %s1716_s22 = sld [smem:[#allocation2]] }
 0x3e7   : > { %v1526_v10 = vmax.f32 %v1466_v9, 0.0  ;;  %v1470_v27 = vadd.f32 %v1469_v32, %v2645_v30  ;;  %v1471_v11 = vpop.f32.mrb[31].mxu0  ;;  %2016 = vrcp.f32 %v2018_v19 }
 0x3e8   : > { %v1527_v34 = vmax.f32 %v1468_v31, 0.0  ;;  %v1472_v36 = vadd.f32 %v1471_v11, %v2645_v30  ;;  %v1336_v51 = vpop.permute.xlu0 %1335 }
 0x3e9   : > { %v1654_v22 = vmul.f32 %v1595_v33, %v1526_v10  ;;  %v1528_v38 = vmax.f32 %v1470_v27, 0.0 }
 0x3ea   : > { %v1655_v26 = vmul.f32 %v1595_v33, %v1527_v34  ;;  %v1529_v59 = vmax.f32 %v1472_v36, 0.0 }
 0x3eb   : > { %v1679_v57 = vadd.f32 %v1678_v21, %v1654_v22  ;;  %v1656_v35 = vmul.f32 %v1600_v53, %v1528_v38 }
 0x3ec   : > { %v1700_v39 = vadd.f32 %v1699_v23, %v1655_v26  ;;  %v1657_v40 = vmul.f32 %v1600_v53, %v1529_v59  ;;  %v1475_v42 = vpop.f32.mrb[32].mxu0  ;;  %v1341_v6 = vpop.permute.xlu0 %1340 }
 0x3ed   : > { %v1680_v12 = vadd.f32 %v1679_v57, %v1656_v35  ;;  %v1476_v43 = vadd.f32 %v1475_v42, %v1316_v41  ;;  %v1477_v44 = vpop.f32.mrb[33].mxu0  ;;  %v1625_v23 = vpop.permute.xlu1 %1624 }
 0x3ee   : > { %v1701_v45 = vadd.f32 %v1700_v39, %v1657_v40  ;;  %v1478_v46 = vadd.f32 %v1477_v44, %v1316_v41  ;;  %v1479_v47 = vpop.f32.mrb[34].mxu0 }
 0x3ef   : > { %v1530_v49 = vmax.f32 %v1476_v43, 0.0  ;;  %v1480_v30 = vadd.f32 %v1479_v47, %v1321_v25  ;;  %v1481_v50 = vpop.f32.mrb[35].mxu0 }
 0x3f0   : > { %v1531_v52 = vmax.f32 %v1478_v46, 0.0  ;;  %v1482_v54 = vadd.f32 %v1481_v50, %v1321_v25  ;;  %v1346_v10 = vpop.permute.xlu0 %1345 }
 0x3f1   : > { %v1658_v33 = vmul.f32 %v1605_v15, %v1530_v49  ;;  %v1532_v55 = vmax.f32 %v1480_v30, 0.0  ;;  %v1630_v43 = vpop.permute.xlu1 %1629 }
 0x3f2   : > { %v1659_v56 = vmul.f32 %v1605_v15, %v1531_v52  ;;  %v1533_v58 = vmax.f32 %v1482_v54, 0.0 }
 0x3f3   : > { %v1681_v60 = vadd.f32 %v1680_v12, %v1658_v33  ;;  %v1660_v53 = vmul.f32 %v1610_v37, %v1532_v55  ;;  %v2017_v12 = vpop.eup %2016 }
 0x3f4   : > { %v1702_v62 = vadd.f32 %v1701_v45, %v1659_v56  ;;  %v1661_v63 = vmul.f32 %v1610_v37, %v1533_v58  ;;  %v1485_v3 = vpop.f32.mrb[36].mxu0  ;;  %v1351_v44 = vpop.permute.xlu0 %1350  ;;  %v1721_v33 = vmul.f32 0.6, %v2017_v12 }
 0x3f5   : > { %v1682_v41 = vadd.f32 %v1681_v60, %v1660_v53  ;;  %v1486_v7 = vadd.f32 %v1485_v3, %v1326_v17  ;;  %v1487_v8 = vpop.f32.mrb[37].mxu0 }
 0x3f6   : > { %v1703_v13 = vadd.f32 %v1702_v62, %v1661_v63  ;;  %v1488_v2 = vadd.f32 %v1487_v8, %v1326_v17  ;;  %v1489_v14 = vpop.f32.mrb[38].mxu0  ;;  %v1722_v8 = vmul.f32 %v1721_v33, %v1721_v33 }
 0x3f7   : > { %v1534_v24 = vmax.f32 %v1486_v7, 0.0  ;;  %v1490_v25 = vadd.f32 %v1489_v14, %v1331_v28  ;;  %v1491_v16 = vpop.f32.mrb[39].mxu0 }
 0x3f8   : > { %v1535_v18 = vmax.f32 %v1488_v2, 0.0  ;;  %v1492_v15 = vadd.f32 %v1491_v16, %v1331_v28  ;;  %v1635_v63 = vpop.permute.xlu0 %1634 }
 0x3f9   : > { %v1662_v20 = vmul.f32 %v1615_v48, %v1534_v24  ;;  %v1536_v21 = vmax.f32 %v1490_v25, 0.0 }
 0x3fa   : > { %v1663_v9 = vmul.f32 %v1615_v48, %v1535_v18  ;;  %v1537_v29 = vmax.f32 %v1492_v15, 0.0  ;;  %v1723_v15 = vmul.f32 %v1722_v8, %v1721_v33 }
 0x3fb   : > { %v1683_v31 = vadd.f32 %v1682_v41, %v1662_v20  ;;  %v1664_v32 = vmul.f32 %v1620_v1, %v1536_v21 }
 0x3fc   : > { %v1704_v27 = vadd.f32 %v1703_v13, %v1663_v9  ;;  %v1665_v11 = vmul.f32 %v1620_v1, %v1537_v29  ;;  %v1495_v34 = vpop.f32.mrb[40].mxu0  ;;  %v1724_v29 = vmul.f32 %v1723_v15, %v1723_v15 }
 0x3fd   : > { %v1684_v17 = vadd.f32 %v1683_v31, %v1664_v32  ;;  %v1496_v36 = vadd.f32 %v1495_v34, %v1336_v51  ;;  %v1497_v37 = vpop.f32.mrb[41].mxu0  ;;  %v2084_v34 = vmov 1966171168  }
 0x3fe   : > { %v1705_v22 = vadd.f32 %v1704_v27, %v1665_v11  ;;  %v1498_v38 = vadd.f32 %v1497_v37, %v1336_v51  ;;  %v1499_v26 = vpop.f32.mrb[42].mxu0  ;;  %v1725_v27 = vmul.f32 %v1724_v29, %v1724_v29  ;;  %v1717_v37 = vstv %s1716_s22 }
 0x3ff   : > { %v1538_v28 = vmax.f32 %v1496_v36, 0.0  ;;  %v1500_v59 = vadd.f32 %v1499_v26, %v1341_v6  ;;  %v1501_v57 = vpop.f32.mrb[43].mxu0 }
 0x400   : > { %v1539_v35 = vmax.f32 %v1498_v38, 0.0  ;;  %v1502_v39 = vadd.f32 %v1501_v57, %v1341_v6  ;;  %v1640_v6 = vpop.permute.xlu1 %1639  ;;  %v1730_v26 = vrot.slane %v1725_v27, %v379_v4 }
 0x401   : > { %v1666_v40 = vmul.f32 %v1625_v23, %v1538_v28  ;;  %v1540_v42 = vmax.f32 %v1500_v59, 0.0  ;;  %v1734_v59 = vrot.slane %v1725_v27, %v383_v5 }
 0x402   : > { %v1667_v45 = vmul.f32 %v1625_v23, %v1539_v35  ;;  %v1541_v46 = vmax.f32 %v1502_v39, 0.0 }
 0x403   : > { %v1685_v47 = vadd.f32 %v1684_v17, %v1666_v40  ;;  %v1668_v48 = vmul.f32 %v1630_v43, %v1540_v42  ;;  %v1743_v17 = vunpack.c.l.s4 %v2084_v34 }
 0x404   : > { %v1706_v49 = vadd.f32 %v1705_v22, %v1667_v45  ;;  %v1669_v30 = vmul.f32 %v1630_v43, %v1541_v46  ;;  %v1505_v50 = vpop.f32.mrb[44].mxu0 }
 0x405   : > { %v1686_v52 = vadd.f32 %v1685_v47, %v1668_v48  ;;  %v1506_v51 = vadd.f32 %v1505_v50, %v1346_v10  ;;  %v1507_v54 = vpop.f32.mrb[45].mxu0  ;;  %v1744_v57 = vunpack.c.0.s8 %v1743_v17 }
 0x406   : > { %v1707_v55 = vadd.f32 %v1706_v49, %v1669_v30  ;;  %v1508_v56 = vadd.f32 %v1507_v54, %v1346_v10  ;;  %v1509_v58 = vpop.f32.mrb[46].mxu0 }
 0x407   : > { %v1542_v60 = vmax.f32 %v1506_v51, 0.0  ;;  %v1510_v53 = vadd.f32 %v1509_v58, %v1351_v44  ;;  %v1511_v62 = vpop.f32.mrb[47].mxu0  ;;  %v1747_v12 = vsub.s32 %v1744_v57, %v2369_v0 }
 0x408   : > { %v1543_v3 = vmax.f32 %v1508_v56, 0.0  ;;  %v1512_v1 = vadd.f32 %v1511_v62, %v1351_v44 }
 0x409   : > { %v1670_v41 = vmul.f32 %v1635_v63, %v1542_v60  ;;  %v1544_v7 = vmax.f32 %v1510_v53, 0.0 }
 0x40a   : > { %v1671_v13 = vmul.f32 %v1635_v63, %v1543_v3  ;;  %v1545_v2 = vmax.f32 %v1512_v1, 0.0 }
 0x40b   : > { %v1687_v14 = vadd.f32 %v1686_v52, %v1670_v41  ;;  %v1672_v24 = vmul.f32 %v1640_v6, %v1544_v7 }
 0x40c   : > { %v1708_v25 = vadd.f32 %v1707_v55, %v1671_v13  ;;  %v1673_v16 = vmul.f32 %v1640_v6, %v1545_v2 }
 0x40d   : > { %v1688_v18 = vadd.f32 %v1687_v14, %v1672_v24 }
 0x40e   : > { %v1709_v19 = vadd.f32 %v1708_v25, %v1673_v16 }
 0x40f   : > { %v1689_v20 = vrot.slane %v1688_v18, 4 }
 0x410   : > { %v1710_v21 = vrot.slane %v1709_v19, 4 }
 0x411   : > { %v1690_v9 = vadd.f32 %v1689_v20, %v1688_v18 }
 0x412   : > { %v1711_v23 = vadd.f32 %v1710_v21, %v1709_v19 }
 0x413   : > { %v1691_v31 = vrot.slane %v1690_v9, 2 }
 0x414   : > { %v1712_v32 = vrot.slane %v1711_v23, 2 }
 0x415   : > { %v1692_v10 = vadd.f32 %v1691_v31, %v1690_v9 }
 0x416   : > { %v1713_v11 = vadd.f32 %v1712_v32, %v1711_v23 }
 0x417   : > { %v1693_v36 = vrot.slane %v1692_v10, 1 }
 0x418   : > { %v1714_v22 = vrot.slane %v1713_v11, 1 }
 0x419   : > { %v1694_v38 = vadd.f32 %v1693_v36, %v1692_v10 }
 0x41a   : > { %v1715_v28 = vadd.f32 %v1714_v22, %v1713_v11 }
 0x41b   : > { %v1718_v35 = vadd.f32 %v1717_v37, %v1694_v38 }
 0x41c   : > { %v1719_v39 = vadd.f32 %v1717_v37, %v1715_v28 }
 0x41d   : > { %v1737_v40 = vadd.f32 %v1730_v26, %v1718_v35 }
 0x41e   : > { %v1738_v42 = vadd.f32 %v1734_v59, %v1719_v39 }
 0x420   : > { %v1741_v43 = vcombine.low %v1737_v40, %v1738_v42 }
 0x422   : > { %v1748_v44 = vrot.slane %v1741_v43, %v1747_v12 }
 0x424   : > { %v1755_v4 = vrot.slane %v1748_v44, %v1747_v12 }
 0x426   : > { %1761 = vst.msk [vmem:[%s271_s14] sm:$0x3] %vm1759_vm0, %v1755_v4 }
 0x427   : > { %2032 = shalt.err (!%p2029_p3)
}
 0x428   : > { %s2033_s25 = scalar_lea.hbm %s2663_s18, 32  ;;  %s2037_s21 = scalar_lea.hbm %s2712_s7, 128 }
 0x429   : > { %p2034_p4 = scmp.ne.s32.totalorder %s2663_s18, %s2033_s25  ;;  %p2038_p9 = scmp.lt.u32.totalorder %s2663_s18, %s2712_s7 }
 0x42a   : > { %p2039_p10 = scmp.lt.u32.totalorder %s2037_s21, %s2033_s25  ;;  %p2041_p12 = scmp.lt.u32.totalorder %s2033_s25, %s2663_s18 }
 0x42b   : > { %p2035_p7 = pnand %p2034_p4, %p2167_p5 }
 0x42c   : > { %p2040_p11 = por %p2039_p10, %p2038_p9 }
 0x42d   : > { %p2036_p8 = pneg %p2035_p7 }
 0x42e   : > { %p2042_p13 = por %p2041_p12, %p2040_p11 }
 0x430   : > { %p2043_p0 = pnand %p2042_p13, %p2036_p8 }
 0x432   : > { %2046 = shalt.err (!%p2043_p0)
}
 0x433   : > { %1949 = dma.vmem_to_hbm [thread:$0]  (%p2167_p5), %s2665_s15, 32, %s2663_s18, %s1763_s19  }
 0x434 PF: > { %p1955_p1 = scmp.ge.s32.totalorder %s2081_s29, 2  ;;  %s1789_s14 = sand.u32 1, %s2069_s26  }
 0x435   : > { %s1790_s16 = scalar_lea.sflag [#allocation4], %s1789_s14 }
 0x436   : > { %p1952_p2 = pnand %p1955_p1, %p2171_p6 }
 0x438   : > { %2064 = dma.done.wait (!%p1952_p2), %s1790_s16, 32  }
 0x439   : > { %2066 = vsyncadd (!%p1952_p2), %s1790_s16, 4294967264  ;;  %p18_p3 = scmp.ge.s32.totalorder %s2154_s8, 6   ;;  %s2715_s26 = smov %s2073_s27 }
 0x43a   : > { %s2716_s27 = smov %s2077_s28  ;;  %s2717_s28 = smov %s2165_s11 }
 0x43b   : > { %s2718_s29 = smov %s2154_s8  ;;  %20 = sbr.rel (!%p18_p3) target bundleno = 5 (0x5), region = 87 }
 0x442   :  { %1795 = vsyncpa [#allocation4], 1 }
 0x443   :  { %1797 = vsyncpa [#allocation4 + $0x1], 1 }

</bundles_post_ra>
